<compile_context>
chip_gen: v7x
topology: tpu7x:2x2x1
jax: 0.10.0
libtpu: 0.0.40
codegen_flags: <defaults>
</compile_context>

<pallas_src>
import jax
import jax.numpy as jnp
from jax import lax
from jax.experimental import pallas as pl
from jax.experimental.pallas import tpu as pltpu

# ---- constants from the PyTorch module -------------------------------------
DT = 1e-4          # dt
ALPHA = 0.05       # alpha_1 parameter (declared, unused in forward)
BETA = 0.8         # beta_1 parameter (declared, unused in forward)

# utils.sLIFin(0.1, 30, -50, 0.0002, 0.1, 0.1, -20)
# TODO(synk): utils.sLIFin source is not provided; implemented as a standard
# second-order (synaptic) LIF with syn/mem decays from constructor args 5 & 6
# and the module's `threshold` parameter as the spike threshold (soft reset).
SLIF_ALPHA = 0.1   # synaptic-current decay
SLIF_BETA = 0.1    # membrane decay

# lif_model(current_nA, dt)
# TODO(synk): lif_model (numpy) source is not provided; implemented as a standard
# LIF in mV consistent with the (-70, -40) normalization used in forward().
V_REST = -70.0
V_TH = -40.0
V_RESET = -70.0
TAU_M = 0.01       # 10 ms membrane time constant
R_M = 0.01         # membrane resistance (mV per input unit)

LEAK = DT / TAU_M                    # 0.01
ONE_MINUS_LEAK = 1.0 - LEAK          # folded leak factor on V
DRIVE_COEF = 1000.0 * R_M * LEAK     # (cur * 1000) * R_m * leak, folded to one multiply
BIAS_COEF = V_REST * LEAK            # leak-to-rest term, folded
NORM_SCALE = 1.0 / (V_TH - V_REST)   # 1/30  -> (V + 70) / 30

UNROLL = 8                           # timesteps per aligned (UNROLL, gb, 128) input load
LANES = 128


def proxy_net_kernel(params_ref, x_ref,
                     memdaq_ref, outmem_ref, spkdaq_ref, spkproxy_ref,
                     syn_ref, mem_ref, v_ref):
    """params_ref: SMEM (2,) [scale_fator, threshold]; x_ref: VMEM (tile_t, gb, 128)."""
    scale = params_ref[0]
    # Hoist the threshold splat out of the time loop (broadcast_in_dim is not CSE'd).
    vth = jnp.full(syn_ref.shape, params_ref[1], jnp.float32)

    # Recurrent state lives in VMEM scratch so it persists across the sequential
    # time-grid axis; re-initialize at the first time block of each batch block.
    @pl.when(pl.program_id(1) == 0)
    def _():
        syn_ref[...] = jnp.zeros_like(syn_ref)
        mem_ref[...] = jnp.zeros_like(mem_ref)
        v_ref[...] = jnp.full_like(v_ref, V_REST)

    tile_t = x_ref.shape[0]
    n_sub = tile_t // UNROLL

    def sub_step(s, carry):
        syn, mem, v = carry
        base = pl.multiple_of(s * UNROLL, UNROLL)
        # One aligned (UNROLL, gb, 128) load; input-side multiplies are hoisted off the
        # serial per-timestep dependence chain (bio-LIF drive constant-folded).
        x_tile = x_ref[pl.ds(base, UNROLL)]
        x_scaled = x_tile * scale
        drive = x_tile * DRIVE_COEF + BIAS_COEF

        for k in range(UNROLL):                      # fully unrolled: the two
            t = base + k                             # independent recurrences interleave

            # ---- proxy (DAQ) synaptic LIF + tanh (self.lif1 + self.tanh) ----
            syn = SLIF_ALPHA * syn + x_scaled[k]
            mem = SLIF_BETA * mem + syn
            fired = mem > vth                        # spike on pre-tanh membrane
            spkdaq_ref[t] = fired.astype(jnp.float32)
            mem = jnp.tanh(jnp.where(fired, mem - vth, mem))  # tanh'd mem carried, as in torch
            memdaq_ref[t] = mem

            # ---- biophysical LIF (lif_model) on cur * 1000 at dt ------------
            v = ONE_MINUS_LEAK * v + drive[k]
            fired2 = v >= V_TH
            v = jnp.where(fired2, V_RESET, v)
            outmem_ref[t] = (v - V_REST) * NORM_SCALE          # (V + 70) / 30, post-reset
            spkproxy_ref[t] = fired2.astype(jnp.float32)

        return (syn, mem, v)

    carry = (syn_ref[...], mem_ref[...], v_ref[...])
    n_pair = n_sub // 2
    if n_pair > 0:
        def pair_step(p, c):
            # manual 2x unroll: two 8-step groups per loop body for scheduler overlap
            return sub_step(2 * p + 1, sub_step(2 * p, c))
        carry = lax.fori_loop(0, n_pair, pair_step, carry)
    if n_sub % 2:
        carry = sub_step(n_sub - 1, carry)

    syn, mem, v = carry
    syn_ref[...] = syn
    mem_ref[...] = mem
    v_ref[...] = v


def _round_up(x, m):
    return ((x + m - 1) // m) * m


def proxy_net_forward(x, params, *, max_tile_t=512, max_groups_per_block=8):
    """x: (B, T) float32 (PyTorch convention: x[:, step]).  params: [scale_fator, threshold].
    Returns (mem_daq, out_mem, spikes_daq, spk_), each (T, B) float32, matching the
    torch.stack axes of the original forward()."""
    x = jnp.asarray(x, jnp.float32)
    params = jnp.asarray(params, jnp.float32)
    B, T = x.shape

    # Batch packed onto sublane-groups x 128 lanes: Bp = G * 128, gb groups per block.
    Bp = _round_up(B, LANES)
    G = Bp // LANES
    if G <= max_groups_per_block:
        gb = G                                   # full batch-group dim in one block
    else:
        gb = max(8, (max_groups_per_block // 8) * 8)   # keep (8,128) tiling of last 2 dims
        G = _round_up(G, gb)
        Bp = G * LANES

    tile_cap = max(UNROLL, (max_tile_t // UNROLL) * UNROLL)
    Tt = _round_up(T, UNROLL)
    tile_t = Tt if Tt <= tile_cap else tile_cap
    Tp = _round_up(Tt, tile_t)

    # Time-major layout (time on the recurrence/grid axis, batch on sublanes x lanes).
    # TODO(synk): a time-major producer would avoid this wrapper pad+transpose pass.
    xt = jnp.pad(x.T, ((0, Tp - T), (0, Bp - B))).reshape(Tp, G, LANES)

    grid = (G // gb, Tp // tile_t)               # (batch blocks ||, time blocks sequential)
    data_spec = pl.BlockSpec((tile_t, gb, LANES), lambda b, t: (t, b, 0))

    # VMEM: (1 in + 4 out) x 2 buffers x tile_t*gb*128*4B  (~20 MiB at 512 x 8 x 128),
    # kept under the explicit 32 MiB limit -> safe on v5e/v6e/v7x.
    out_sds = tuple(jax.ShapeDtypeStruct((Tp, G, LANES), jnp.float32) for _ in range(4))
    outs = pl.pallas_call(
        proxy_net_kernel,
        out_shape=out_sds,
        grid_spec=pltpu.PrefetchScalarGridSpec(
            num_scalar_prefetch=0,
            grid=grid,
            in_specs=[
                pl.BlockSpec(memory_space=pltpu.MemorySpace.SMEM),  # scalar params
                data_spec,                                          # x tiles
            ],
            out_specs=(data_spec, data_spec, data_spec, data_spec),
            scratch_shapes=[
                pltpu.VMEM((gb, LANES), jnp.float32),   # syn (proxy LIF)
                pltpu.VMEM((gb, LANES), jnp.float32),   # mem (post-tanh, carried)
                pltpu.VMEM((gb, LANES), jnp.float32),   # V   (biophysical LIF)
            ],
        ),
        compiler_params=pltpu.CompilerParams(
            dimension_semantics=("parallel", "arbitrary"),
            vmem_limit_bytes=32 * 1024 * 1024,
        ),
    )(params, xt)

    mem_daq, out_mem, spikes_daq, spk_ = (o.reshape(Tp, Bp)[:T, :B] for o in outs)
    return mem_daq, out_mem, spikes_daq, spk_


if __name__ == "__main__":
    key = jax.random.PRNGKey(0)
    # small shapes consistent with the module: x indexed as x[:, step] -> (batch, time)
    batch, time_steps = 4, 16
    x = jax.random.uniform(key, (batch, time_steps), dtype=jnp.float32)

    # deterministic parameter init (values from proxy_net.__init__)
    scale_fator = 1.0
    threshold = 0.8
    params = jnp.array([scale_fator, threshold], dtype=jnp.float32)

    outs = proxy_net_forward(x, params)
    outs = jax.block_until_ready(outs)

    mem_daq, out_mem, spikes_daq, spk_ = outs
    for o in outs:
        assert o.shape == (time_steps, batch)
        assert bool(jnp.all(jnp.isfinite(o)))

    # Tiling-invariance check: multiple time blocks (state carried through VMEM
    # scratch across the sequential grid axis) must reproduce the single-block result.
    outs_tiled = jax.block_until_ready(proxy_net_forward(x, params, max_tile_t=8))
    for a, b in zip(outs, outs_tiled):
        assert bool(jnp.allclose(a, b, rtol=1e-6, atol=1e-6))

    print("KERNEL_OK")
</pallas_src>

<mosaic_0001>
module attributes {stable_mosaic.version = 11 : i64} {
  func.func @proxy_net_kernel(%arg0: i32, %arg1: i32, %arg2: memref<2xf32, #tpu.memory_space<smem>>, %arg3: memref<16x1x128xf32, #tpu.memory_space<vmem>>, %arg4: memref<16x1x128xf32, #tpu.memory_space<vmem>>, %arg5: memref<16x1x128xf32, #tpu.memory_space<vmem>>, %arg6: memref<16x1x128xf32, #tpu.memory_space<vmem>>, %arg7: memref<16x1x128xf32, #tpu.memory_space<vmem>>, %arg8: memref<1x128xf32, #tpu.memory_space<vmem>>, %arg9: memref<1x128xf32, #tpu.memory_space<vmem>>, %arg10: memref<1x128xf32, #tpu.memory_space<vmem>>) attributes {dimension_semantics = [#tpu.dimension_semantics<parallel>, #tpu.dimension_semantics<arbitrary>], iteration_bounds = array<i64: 1, 1>, scalar_prefetch = 0 : i64, scratch_operands = 3 : i64, tpu.core_type = #tpu.core_type<tc>, window_params = [{transform_indices = @transform_0, window_bounds = array<i64: 2>}, {transform_indices = @transform_1, window_bounds = array<i64: 16, 1, 128>}, {transform_indices = @transform_2, window_bounds = array<i64: 16, 1, 128>}, {transform_indices = @transform_3, window_bounds = array<i64: 16, 1, 128>}, {transform_indices = @transform_4, window_bounds = array<i64: 16, 1, 128>}, {transform_indices = @transform_5, window_bounds = array<i64: 16, 1, 128>}]} {
    %c0 = arith.constant 0 : index
    %0 = memref.load %arg2[%c0] : memref<2xf32, #tpu.memory_space<smem>>
    %c1 = arith.constant 1 : index
    %1 = memref.load %arg2[%c1] : memref<2xf32, #tpu.memory_space<smem>>
    %2 = vector.broadcast %1 : f32 to vector<1x128xf32>
    %c0_i32 = arith.constant 0 : i32
    %3 = arith.cmpi eq, %arg1, %c0_i32 : i32
    %4 = arith.extui %3 : i1 to i32
    %c0_i32_0 = arith.constant 0 : i32
    %5 = arith.cmpi ne, %4, %c0_i32_0 : i32
    scf.if %5 {
      %cst_275 = arith.constant 0.000000e+00 : f32
      %771 = vector.broadcast %cst_275 : f32 to vector<1x128xf32>
      %c0_276 = arith.constant 0 : index
      %c0_277 = arith.constant 0 : index
      %772 = vector.load %arg8[%c0_276, %c0_277] : memref<1x128xf32, #tpu.memory_space<vmem>>, vector<1x128xf32>
      tpu.vector_store %arg8[%c0_276, %c0_277], %771 {strides = array<i32>} : memref<1x128xf32, #tpu.memory_space<vmem>>, vector<1x128xf32>,
      %cst_278 = arith.constant 0.000000e+00 : f32
      %773 = vector.broadcast %cst_278 : f32 to vector<1x128xf32>
      %c0_279 = arith.constant 0 : index
      %c0_280 = arith.constant 0 : index
      %774 = vector.load %arg9[%c0_279, %c0_280] : memref<1x128xf32, #tpu.memory_space<vmem>>, vector<1x128xf32>
      tpu.vector_store %arg9[%c0_279, %c0_280], %773 {strides = array<i32>} : memref<1x128xf32, #tpu.memory_space<vmem>>, vector<1x128xf32>,
      %cst_281 = arith.constant -7.000000e+01 : f32
      %775 = vector.broadcast %cst_281 : f32 to vector<1x128xf32>
      %c0_282 = arith.constant 0 : index
      %c0_283 = arith.constant 0 : index
      %776 = vector.load %arg10[%c0_282, %c0_283] : memref<1x128xf32, #tpu.memory_space<vmem>>, vector<1x128xf32>
      tpu.vector_store %arg10[%c0_282, %c0_283], %775 {strides = array<i32>} : memref<1x128xf32, #tpu.memory_space<vmem>>, vector<1x128xf32>,
    } else {
    }
    %c0_1 = arith.constant 0 : index
    %c0_2 = arith.constant 0 : index
    %6 = vector.load %arg8[%c0_1, %c0_2] : memref<1x128xf32, #tpu.memory_space<vmem>>, vector<1x128xf32>
    %c0_3 = arith.constant 0 : index
    %c0_4 = arith.constant 0 : index
    %7 = vector.load %arg9[%c0_3, %c0_4] : memref<1x128xf32, #tpu.memory_space<vmem>>, vector<1x128xf32>
    %c0_5 = arith.constant 0 : index
    %c0_6 = arith.constant 0 : index
    %8 = vector.load %arg10[%c0_5, %c0_6] : memref<1x128xf32, #tpu.memory_space<vmem>>, vector<1x128xf32>
    %c0_i32_7 = arith.constant 0 : i32
    %c2_i32 = arith.constant 2 : i32
    %9 = arith.muli %c2_i32, %c0_i32_7 : i32
    %c1_i32 = arith.constant 1 : i32
    %10 = arith.addi %9, %c1_i32 : i32
    %c2_i32_8 = arith.constant 2 : i32
    %11 = arith.muli %c2_i32_8, %c0_i32_7 : i32
    %c8_i32 = arith.constant 8 : i32
    %12 = arith.muli %11, %c8_i32 : i32
    %13 = tpu.assume_multiple %12, 8 : i32
    %14 = arith.index_cast %13 : i32 to index
    %c0_9 = arith.constant 0 : index
    %c0_10 = arith.constant 0 : index
    %15 = vector.load %arg3[%14, %c0_9, %c0_10] : memref<16x1x128xf32, #tpu.memory_space<vmem>>, vector<8x1x128xf32>
    %16 = vector.broadcast %0 : f32 to vector<8x1x128xf32>
    %17 = arith.mulf %15, %16 : vector<8x1x128xf32>
    %cst = arith.constant 1.000000e-01 : f32
    %18 = vector.broadcast %cst : f32 to vector<8x1x128xf32>
    %19 = arith.mulf %15, %18 : vector<8x1x128xf32>
    %cst_11 = arith.constant -0.699999988 : f32
    %20 = vector.broadcast %cst_11 : f32 to vector<8x1x128xf32>
    %21 = arith.addf %19, %20 : vector<8x1x128xf32>
    %c0_i32_12 = arith.constant 0 : i32
    %22 = arith.addi %13, %c0_i32_12 : i32
    %cst_13 = arith.constant 1.000000e-01 : f32
    %23 = vector.broadcast %cst_13 : f32 to vector<1x128xf32>
    %24 = arith.mulf %23, %6 : vector<1x128xf32>
    %25 = vector.extract_strided_slice %17 {offsets = [0, 0, 0], sizes = [1, 1, 128], strides = [1, 1, 1]} : vector<8x1x128xf32> to vector<1x1x128xf32>
    %26 = vector.shape_cast %25 : vector<1x1x128xf32> to vector<1x128xf32>
    %27 = arith.addf %24, %26 : vector<1x128xf32>
    %cst_14 = arith.constant 1.000000e-01 : f32
    %28 = vector.broadcast %cst_14 : f32 to vector<1x128xf32>
    %29 = arith.mulf %28, %7 : vector<1x128xf32>
    %30 = arith.addf %29, %27 : vector<1x128xf32>
    %31 = arith.cmpf ogt, %30, %2 : vector<1x128xf32>
    %32 = arith.extui %31 : vector<1x128xi1> to vector<1x128xi32>
    %33 = arith.sitofp %32 : vector<1x128xi32> to vector<1x128xf32>
    %34 = arith.index_cast %22 : i32 to index
    %c0_15 = arith.constant 0 : index
    %c0_16 = arith.constant 0 : index
    %35 = vector.load %arg6[%34, %c0_15, %c0_16] : memref<16x1x128xf32, #tpu.memory_space<vmem>>, vector<1x1x128xf32>
    %36 = vector.shape_cast %35 : vector<1x1x128xf32> to vector<1x128xf32>
    %37 = vector.shape_cast %33 : vector<1x128xf32> to vector<1x1x128xf32>
    tpu.vector_store %arg6[%34, %c0_15, %c0_16], %37 {strides = array<i32>} : memref<16x1x128xf32, #tpu.memory_space<vmem>>, vector<1x1x128xf32>,
    %38 = arith.subf %30, %2 : vector<1x128xf32>
    %39 = arith.select %31, %38, %30 : vector<1x128xi1>, vector<1x128xf32>
    %40 = math.tanh %39 : vector<1x128xf32>
    %41 = arith.index_cast %22 : i32 to index
    %c0_17 = arith.constant 0 : index
    %c0_18 = arith.constant 0 : index
    %42 = vector.load %arg4[%41, %c0_17, %c0_18] : memref<16x1x128xf32, #tpu.memory_space<vmem>>, vector<1x1x128xf32>
    %43 = vector.shape_cast %42 : vector<1x1x128xf32> to vector<1x128xf32>
    %44 = vector.shape_cast %40 : vector<1x128xf32> to vector<1x1x128xf32>
    tpu.vector_store %arg4[%41, %c0_17, %c0_18], %44 {strides = array<i32>} : memref<16x1x128xf32, #tpu.memory_space<vmem>>, vector<1x1x128xf32>,
    %cst_19 = arith.constant 9.900000e-01 : f32
    %45 = vector.broadcast %cst_19 : f32 to vector<1x128xf32>
    %46 = arith.mulf %45, %8 : vector<1x128xf32>
    %47 = vector.extract_strided_slice %21 {offsets = [0, 0, 0], sizes = [1, 1, 128], strides = [1, 1, 1]} : vector<8x1x128xf32> to vector<1x1x128xf32>
    %48 = vector.shape_cast %47 : vector<1x1x128xf32> to vector<1x128xf32>
    %49 = arith.addf %46, %48 : vector<1x128xf32>
    %cst_20 = arith.constant -4.000000e+01 : f32
    %50 = vector.broadcast %cst_20 : f32 to vector<1x128xf32>
    %51 = arith.cmpf oge, %49, %50 : vector<1x128xf32>
    %cst_21 = arith.constant -7.000000e+01 : f32
    %52 = vector.broadcast %cst_21 : f32 to vector<1x128xf32>
    %53 = arith.select %51, %52, %49 : vector<1x128xi1>, vector<1x128xf32>
    %cst_22 = arith.constant -7.000000e+01 : f32
    %54 = vector.broadcast %cst_22 : f32 to vector<1x128xf32>
    %55 = arith.subf %53, %54 : vector<1x128xf32>
    %cst_23 = arith.constant 0.0333333351 : f32
    %56 = vector.broadcast %cst_23 : f32 to vector<1x128xf32>
    %57 = arith.mulf %55, %56 : vector<1x128xf32>
    %58 = arith.index_cast %22 : i32 to index
    %c0_24 = arith.constant 0 : index
    %c0_25 = arith.constant 0 : index
    %59 = vector.load %arg5[%58, %c0_24, %c0_25] : memref<16x1x128xf32, #tpu.memory_space<vmem>>, vector<1x1x128xf32>
    %60 = vector.shape_cast %59 : vector<1x1x128xf32> to vector<1x128xf32>
    %61 = vector.shape_cast %57 : vector<1x128xf32> to vector<1x1x128xf32>
    tpu.vector_store %arg5[%58, %c0_24, %c0_25], %61 {strides = array<i32>} : memref<16x1x128xf32, #tpu.memory_space<vmem>>, vector<1x1x128xf32>,
    %62 = arith.extui %51 : vector<1x128xi1> to vector<1x128xi32>
    %63 = arith.sitofp %62 : vector<1x128xi32> to vector<1x128xf32>
    %64 = arith.index_cast %22 : i32 to index
    %c0_26 = arith.constant 0 : index
    %c0_27 = arith.constant 0 : index
    %65 = vector.load %arg7[%64, %c0_26, %c0_27] : memref<16x1x128xf32, #tpu.memory_space<vmem>>, vector<1x1x128xf32>
    %66 = vector.shape_cast %65 : vector<1x1x128xf32> to vector<1x128xf32>
    %67 = vector.shape_cast %63 : vector<1x128xf32> to vector<1x1x128xf32>
    tpu.vector_store %arg7[%64, %c0_26, %c0_27], %67 {strides = array<i32>} : memref<16x1x128xf32, #tpu.memory_space<vmem>>, vector<1x1x128xf32>,
    %c1_i32_28 = arith.constant 1 : i32
    %68 = arith.addi %13, %c1_i32_28 : i32
    %cst_29 = arith.constant 1.000000e-01 : f32
    %69 = vector.broadcast %cst_29 : f32 to vector<1x128xf32>
    %70 = arith.mulf %69, %27 : vector<1x128xf32>
    %71 = vector.extract_strided_slice %17 {offsets = [1, 0, 0], sizes = [1, 1, 128], strides = [1, 1, 1]} : vector<8x1x128xf32> to vector<1x1x128xf32>
    %72 = vector.shape_cast %71 : vector<1x1x128xf32> to vector<1x128xf32>
    %73 = arith.addf %70, %72 : vector<1x128xf32>
    %cst_30 = arith.constant 1.000000e-01 : f32
    %74 = vector.broadcast %cst_30 : f32 to vector<1x128xf32>
    %75 = arith.mulf %74, %40 : vector<1x128xf32>
    %76 = arith.addf %75, %73 : vector<1x128xf32>
    %77 = arith.cmpf ogt, %76, %2 : vector<1x128xf32>
    %78 = arith.extui %77 : vector<1x128xi1> to vector<1x128xi32>
    %79 = arith.sitofp %78 : vector<1x128xi32> to vector<1x128xf32>
    %80 = arith.index_cast %68 : i32 to index
    %c0_31 = arith.constant 0 : index
    %c0_32 = arith.constant 0 : index
    %81 = vector.load %arg6[%80, %c0_31, %c0_32] : memref<16x1x128xf32, #tpu.memory_space<vmem>>, vector<1x1x128xf32>
    %82 = vector.shape_cast %81 : vector<1x1x128xf32> to vector<1x128xf32>
    %83 = vector.shape_cast %79 : vector<1x128xf32> to vector<1x1x128xf32>
    tpu.vector_store %arg6[%80, %c0_31, %c0_32], %83 {strides = array<i32>} : memref<16x1x128xf32, #tpu.memory_space<vmem>>, vector<1x1x128xf32>,
    %84 = arith.subf %76, %2 : vector<1x128xf32>
    %85 = arith.select %77, %84, %76 : vector<1x128xi1>, vector<1x128xf32>
    %86 = math.tanh %85 : vector<1x128xf32>
    %87 = arith.index_cast %68 : i32 to index
    %c0_33 = arith.constant 0 : index
    %c0_34 = arith.constant 0 : index
    %88 = vector.load %arg4[%87, %c0_33, %c0_34] : memref<16x1x128xf32, #tpu.memory_space<vmem>>, vector<1x1x128xf32>
    %89 = vector.shape_cast %88 : vector<1x1x128xf32> to vector<1x128xf32>
    %90 = vector.shape_cast %86 : vector<1x128xf32> to vector<1x1x128xf32>
    tpu.vector_store %arg4[%87, %c0_33, %c0_34], %90 {strides = array<i32>} : memref<16x1x128xf32, #tpu.memory_space<vmem>>, vector<1x1x128xf32>,
    %cst_35 = arith.constant 9.900000e-01 : f32
    %91 = vector.broadcast %cst_35 : f32 to vector<1x128xf32>
    %92 = arith.mulf %91, %53 : vector<1x128xf32>
    %93 = vector.extract_strided_slice %21 {offsets = [1, 0, 0], sizes = [1, 1, 128], strides = [1, 1, 1]} : vector<8x1x128xf32> to vector<1x1x128xf32>
    %94 = vector.shape_cast %93 : vector<1x1x128xf32> to vector<1x128xf32>
    %95 = arith.addf %92, %94 : vector<1x128xf32>
    %cst_36 = arith.constant -4.000000e+01 : f32
    %96 = vector.broadcast %cst_36 : f32 to vector<1x128xf32>
    %97 = arith.cmpf oge, %95, %96 : vector<1x128xf32>
    %cst_37 = arith.constant -7.000000e+01 : f32
    %98 = vector.broadcast %cst_37 : f32 to vector<1x128xf32>
    %99 = arith.select %97, %98, %95 : vector<1x128xi1>, vector<1x128xf32>
    %cst_38 = arith.constant -7.000000e+01 : f32
    %100 = vector.broadcast %cst_38 : f32 to vector<1x128xf32>
    %101 = arith.subf %99, %100 : vector<1x128xf32>
    %cst_39 = arith.constant 0.0333333351 : f32
    %102 = vector.broadcast %cst_39 : f32 to vector<1x128xf32>
    %103 = arith.mulf %101, %102 : vector<1x128xf32>
    %104 = arith.index_cast %68 : i32 to index
    %c0_40 = arith.constant 0 : index
    %c0_41 = arith.constant 0 : index
    %105 = vector.load %arg5[%104, %c0_40, %c0_41] : memref<16x1x128xf32, #tpu.memory_space<vmem>>, vector<1x1x128xf32>
    %106 = vector.shape_cast %105 : vector<1x1x128xf32> to vector<1x128xf32>
    %107 = vector.shape_cast %103 : vector<1x128xf32> to vector<1x1x128xf32>
    tpu.vector_store %arg5[%104, %c0_40, %c0_41], %107 {strides = array<i32>} : memref<16x1x128xf32, #tpu.memory_space<vmem>>, vector<1x1x128xf32>,
    %108 = arith.extui %97 : vector<1x128xi1> to vector<1x128xi32>
    %109 = arith.sitofp %108 : vector<1x128xi32> to vector<1x128xf32>
    %110 = arith.index_cast %68 : i32 to index
    %c0_42 = arith.constant 0 : index
    %c0_43 = arith.constant 0 : index
    %111 = vector.load %arg7[%110, %c0_42, %c0_43] : memref<16x1x128xf32, #tpu.memory_space<vmem>>, vector<1x1x128xf32>
    %112 = vector.shape_cast %111 : vector<1x1x128xf32> to vector<1x128xf32>
    %113 = vector.shape_cast %109 : vector<1x128xf32> to vector<1x1x128xf32>
    tpu.vector_store %arg7[%110, %c0_42, %c0_43], %113 {strides = array<i32>} : memref<16x1x128xf32, #tpu.memory_space<vmem>>, vector<1x1x128xf32>,
    %c2_i32_44 = arith.constant 2 : i32
    %114 = arith.addi %13, %c2_i32_44 : i32
    %cst_45 = arith.constant 1.000000e-01 : f32
    %115 = vector.broadcast %cst_45 : f32 to vector<1x128xf32>
    %116 = arith.mulf %115, %73 : vector<1x128xf32>
    %117 = vector.extract_strided_slice %17 {offsets = [2, 0, 0], sizes = [1, 1, 128], strides = [1, 1, 1]} : vector<8x1x128xf32> to vector<1x1x128xf32>
    %118 = vector.shape_cast %117 : vector<1x1x128xf32> to vector<1x128xf32>
    %119 = arith.addf %116, %118 : vector<1x128xf32>
    %cst_46 = arith.constant 1.000000e-01 : f32
    %120 = vector.broadcast %cst_46 : f32 to vector<1x128xf32>
    %121 = arith.mulf %120, %86 : vector<1x128xf32>
    %122 = arith.addf %121, %119 : vector<1x128xf32>
    %123 = arith.cmpf ogt, %122, %2 : vector<1x128xf32>
    %124 = arith.extui %123 : vector<1x128xi1> to vector<1x128xi32>
    %125 = arith.sitofp %124 : vector<1x128xi32> to vector<1x128xf32>
    %126 = arith.index_cast %114 : i32 to index
    %c0_47 = arith.constant 0 : index
    %c0_48 = arith.constant 0 : index
    %127 = vector.load %arg6[%126, %c0_47, %c0_48] : memref<16x1x128xf32, #tpu.memory_space<vmem>>, vector<1x1x128xf32>
    %128 = vector.shape_cast %127 : vector<1x1x128xf32> to vector<1x128xf32>
    %129 = vector.shape_cast %125 : vector<1x128xf32> to vector<1x1x128xf32>
    tpu.vector_store %arg6[%126, %c0_47, %c0_48], %129 {strides = array<i32>} : memref<16x1x128xf32, #tpu.memory_space<vmem>>, vector<1x1x128xf32>,
    %130 = arith.subf %122, %2 : vector<1x128xf32>
    %131 = arith.select %123, %130, %122 : vector<1x128xi1>, vector<1x128xf32>
    %132 = math.tanh %131 : vector<1x128xf32>
    %133 = arith.index_cast %114 : i32 to index
    %c0_49 = arith.constant 0 : index
    %c0_50 = arith.constant 0 : index
    %134 = vector.load %arg4[%133, %c0_49, %c0_50] : memref<16x1x128xf32, #tpu.memory_space<vmem>>, vector<1x1x128xf32>
    %135 = vector.shape_cast %134 : vector<1x1x128xf32> to vector<1x128xf32>
    %136 = vector.shape_cast %132 : vector<1x128xf32> to vector<1x1x128xf32>
    tpu.vector_store %arg4[%133, %c0_49, %c0_50], %136 {strides = array<i32>} : memref<16x1x128xf32, #tpu.memory_space<vmem>>, vector<1x1x128xf32>,
    %cst_51 = arith.constant 9.900000e-01 : f32
    %137 = vector.broadcast %cst_51 : f32 to vector<1x128xf32>
    %138 = arith.mulf %137, %99 : vector<1x128xf32>
    %139 = vector.extract_strided_slice %21 {offsets = [2, 0, 0], sizes = [1, 1, 128], strides = [1, 1, 1]} : vector<8x1x128xf32> to vector<1x1x128xf32>
    %140 = vector.shape_cast %139 : vector<1x1x128xf32> to vector<1x128xf32>
    %141 = arith.addf %138, %140 : vector<1x128xf32>
    %cst_52 = arith.constant -4.000000e+01 : f32
    %142 = vector.broadcast %cst_52 : f32 to vector<1x128xf32>
    %143 = arith.cmpf oge, %141, %142 : vector<1x128xf32>
    %cst_53 = arith.constant -7.000000e+01 : f32
    %144 = vector.broadcast %cst_53 : f32 to vector<1x128xf32>
    %145 = arith.select %143, %144, %141 : vector<1x128xi1>, vector<1x128xf32>
    %cst_54 = arith.constant -7.000000e+01 : f32
    %146 = vector.broadcast %cst_54 : f32 to vector<1x128xf32>
    %147 = arith.subf %145, %146 : vector<1x128xf32>
    %cst_55 = arith.constant 0.0333333351 : f32
    %148 = vector.broadcast %cst_55 : f32 to vector<1x128xf32>
    %149 = arith.mulf %147, %148 : vector<1x128xf32>
    %150 = arith.index_cast %114 : i32 to index
    %c0_56 = arith.constant 0 : index
    %c0_57 = arith.constant 0 : index
    %151 = vector.load %arg5[%150, %c0_56, %c0_57] : memref<16x1x128xf32, #tpu.memory_space<vmem>>, vector<1x1x128xf32>
    %152 = vector.shape_cast %151 : vector<1x1x128xf32> to vector<1x128xf32>
    %153 = vector.shape_cast %149 : vector<1x128xf32> to vector<1x1x128xf32>
    tpu.vector_store %arg5[%150, %c0_56, %c0_57], %153 {strides = array<i32>} : memref<16x1x128xf32, #tpu.memory_space<vmem>>, vector<1x1x128xf32>,
    %154 = arith.extui %143 : vector<1x128xi1> to vector<1x128xi32>
    %155 = arith.sitofp %154 : vector<1x128xi32> to vector<1x128xf32>
    %156 = arith.index_cast %114 : i32 to index
    %c0_58 = arith.constant 0 : index
    %c0_59 = arith.constant 0 : index
    %157 = vector.load %arg7[%156, %c0_58, %c0_59] : memref<16x1x128xf32, #tpu.memory_space<vmem>>, vector<1x1x128xf32>
    %158 = vector.shape_cast %157 : vector<1x1x128xf32> to vector<1x128xf32>
    %159 = vector.shape_cast %155 : vector<1x128xf32> to vector<1x1x128xf32>
    tpu.vector_store %arg7[%156, %c0_58, %c0_59], %159 {strides = array<i32>} : memref<16x1x128xf32, #tpu.memory_space<vmem>>, vector<1x1x128xf32>,
    %c3_i32 = arith.constant 3 : i32
    %160 = arith.addi %13, %c3_i32 : i32
    %cst_60 = arith.constant 1.000000e-01 : f32
    %161 = vector.broadcast %cst_60 : f32 to vector<1x128xf32>
    %162 = arith.mulf %161, %119 : vector<1x128xf32>
    %163 = vector.extract_strided_slice %17 {offsets = [3, 0, 0], sizes = [1, 1, 128], strides = [1, 1, 1]} : vector<8x1x128xf32> to vector<1x1x128xf32>
    %164 = vector.shape_cast %163 : vector<1x1x128xf32> to vector<1x128xf32>
    %165 = arith.addf %162, %164 : vector<1x128xf32>
    %cst_61 = arith.constant 1.000000e-01 : f32
    %166 = vector.broadcast %cst_61 : f32 to vector<1x128xf32>
    %167 = arith.mulf %166, %132 : vector<1x128xf32>
    %168 = arith.addf %167, %165 : vector<1x128xf32>
    %169 = arith.cmpf ogt, %168, %2 : vector<1x128xf32>
    %170 = arith.extui %169 : vector<1x128xi1> to vector<1x128xi32>
    %171 = arith.sitofp %170 : vector<1x128xi32> to vector<1x128xf32>
    %172 = arith.index_cast %160 : i32 to index
    %c0_62 = arith.constant 0 : index
    %c0_63 = arith.constant 0 : index
    %173 = vector.load %arg6[%172, %c0_62, %c0_63] : memref<16x1x128xf32, #tpu.memory_space<vmem>>, vector<1x1x128xf32>
    %174 = vector.shape_cast %173 : vector<1x1x128xf32> to vector<1x128xf32>
    %175 = vector.shape_cast %171 : vector<1x128xf32> to vector<1x1x128xf32>
    tpu.vector_store %arg6[%172, %c0_62, %c0_63], %175 {strides = array<i32>} : memref<16x1x128xf32, #tpu.memory_space<vmem>>, vector<1x1x128xf32>,
    %176 = arith.subf %168, %2 : vector<1x128xf32>
    %177 = arith.select %169, %176, %168 : vector<1x128xi1>, vector<1x128xf32>
    %178 = math.tanh %177 : vector<1x128xf32>
    %179 = arith.index_cast %160 : i32 to index
    %c0_64 = arith.constant 0 : index
    %c0_65 = arith.constant 0 : index
    %180 = vector.load %arg4[%179, %c0_64, %c0_65] : memref<16x1x128xf32, #tpu.memory_space<vmem>>, vector<1x1x128xf32>
    %181 = vector.shape_cast %180 : vector<1x1x128xf32> to vector<1x128xf32>
    %182 = vector.shape_cast %178 : vector<1x128xf32> to vector<1x1x128xf32>
    tpu.vector_store %arg4[%179, %c0_64, %c0_65], %182 {strides = array<i32>} : memref<16x1x128xf32, #tpu.memory_space<vmem>>, vector<1x1x128xf32>,
    %cst_66 = arith.constant 9.900000e-01 : f32
    %183 = vector.broadcast %cst_66 : f32 to vector<1x128xf32>
    %184 = arith.mulf %183, %145 : vector<1x128xf32>
    %185 = vector.extract_strided_slice %21 {offsets = [3, 0, 0], sizes = [1, 1, 128], strides = [1, 1, 1]} : vector<8x1x128xf32> to vector<1x1x128xf32>
    %186 = vector.shape_cast %185 : vector<1x1x128xf32> to vector<1x128xf32>
    %187 = arith.addf %184, %186 : vector<1x128xf32>
    %cst_67 = arith.constant -4.000000e+01 : f32
    %188 = vector.broadcast %cst_67 : f32 to vector<1x128xf32>
    %189 = arith.cmpf oge, %187, %188 : vector<1x128xf32>
    %cst_68 = arith.constant -7.000000e+01 : f32
    %190 = vector.broadcast %cst_68 : f32 to vector<1x128xf32>
    %191 = arith.select %189, %190, %187 : vector<1x128xi1>, vector<1x128xf32>
    %cst_69 = arith.constant -7.000000e+01 : f32
    %192 = vector.broadcast %cst_69 : f32 to vector<1x128xf32>
    %193 = arith.subf %191, %192 : vector<1x128xf32>
    %cst_70 = arith.constant 0.0333333351 : f32
    %194 = vector.broadcast %cst_70 : f32 to vector<1x128xf32>
    %195 = arith.mulf %193, %194 : vector<1x128xf32>
    %196 = arith.index_cast %160 : i32 to index
    %c0_71 = arith.constant 0 : index
    %c0_72 = arith.constant 0 : index
    %197 = vector.load %arg5[%196, %c0_71, %c0_72] : memref<16x1x128xf32, #tpu.memory_space<vmem>>, vector<1x1x128xf32>
    %198 = vector.shape_cast %197 : vector<1x1x128xf32> to vector<1x128xf32>
    %199 = vector.shape_cast %195 : vector<1x128xf32> to vector<1x1x128xf32>
    tpu.vector_store %arg5[%196, %c0_71, %c0_72], %199 {strides = array<i32>} : memref<16x1x128xf32, #tpu.memory_space<vmem>>, vector<1x1x128xf32>,
    %200 = arith.extui %189 : vector<1x128xi1> to vector<1x128xi32>
    %201 = arith.sitofp %200 : vector<1x128xi32> to vector<1x128xf32>
    %202 = arith.index_cast %160 : i32 to index
    %c0_73 = arith.constant 0 : index
    %c0_74 = arith.constant 0 : index
    %203 = vector.load %arg7[%202, %c0_73, %c0_74] : memref<16x1x128xf32, #tpu.memory_space<vmem>>, vector<1x1x128xf32>
    %204 = vector.shape_cast %203 : vector<1x1x128xf32> to vector<1x128xf32>
    %205 = vector.shape_cast %201 : vector<1x128xf32> to vector<1x1x128xf32>
    tpu.vector_store %arg7[%202, %c0_73, %c0_74], %205 {strides = array<i32>} : memref<16x1x128xf32, #tpu.memory_space<vmem>>, vector<1x1x128xf32>,
    %c4_i32 = arith.constant 4 : i32
    %206 = arith.addi %13, %c4_i32 : i32
    %cst_75 = arith.constant 1.000000e-01 : f32
    %207 = vector.broadcast %cst_75 : f32 to vector<1x128xf32>
    %208 = arith.mulf %207, %165 : vector<1x128xf32>
    %209 = vector.extract_strided_slice %17 {offsets = [4, 0, 0], sizes = [1, 1, 128], strides = [1, 1, 1]} : vector<8x1x128xf32> to vector<1x1x128xf32>
    %210 = vector.shape_cast %209 : vector<1x1x128xf32> to vector<1x128xf32>
    %211 = arith.addf %208, %210 : vector<1x128xf32>
    %cst_76 = arith.constant 1.000000e-01 : f32
    %212 = vector.broadcast %cst_76 : f32 to vector<1x128xf32>
    %213 = arith.mulf %212, %178 : vector<1x128xf32>
    %214 = arith.addf %213, %211 : vector<1x128xf32>
    %215 = arith.cmpf ogt, %214, %2 : vector<1x128xf32>
    %216 = arith.extui %215 : vector<1x128xi1> to vector<1x128xi32>
    %217 = arith.sitofp %216 : vector<1x128xi32> to vector<1x128xf32>
    %218 = arith.index_cast %206 : i32 to index
    %c0_77 = arith.constant 0 : index
    %c0_78 = arith.constant 0 : index
    %219 = vector.load %arg6[%218, %c0_77, %c0_78] : memref<16x1x128xf32, #tpu.memory_space<vmem>>, vector<1x1x128xf32>
    %220 = vector.shape_cast %219 : vector<1x1x128xf32> to vector<1x128xf32>
    %221 = vector.shape_cast %217 : vector<1x128xf32> to vector<1x1x128xf32>
    tpu.vector_store %arg6[%218, %c0_77, %c0_78], %221 {strides = array<i32>} : memref<16x1x128xf32, #tpu.memory_space<vmem>>, vector<1x1x128xf32>,
    %222 = arith.subf %214, %2 : vector<1x128xf32>
    %223 = arith.select %215, %222, %214 : vector<1x128xi1>, vector<1x128xf32>
    %224 = math.tanh %223 : vector<1x128xf32>
    %225 = arith.index_cast %206 : i32 to index
    %c0_79 = arith.constant 0 : index
    %c0_80 = arith.constant 0 : index
    %226 = vector.load %arg4[%225, %c0_79, %c0_80] : memref<16x1x128xf32, #tpu.memory_space<vmem>>, vector<1x1x128xf32>
    %227 = vector.shape_cast %226 : vector<1x1x128xf32> to vector<1x128xf32>
    %228 = vector.shape_cast %224 : vector<1x128xf32> to vector<1x1x128xf32>
    tpu.vector_store %arg4[%225, %c0_79, %c0_80], %228 {strides = array<i32>} : memref<16x1x128xf32, #tpu.memory_space<vmem>>, vector<1x1x128xf32>,
    %cst_81 = arith.constant 9.900000e-01 : f32
    %229 = vector.broadcast %cst_81 : f32 to vector<1x128xf32>
    %230 = arith.mulf %229, %191 : vector<1x128xf32>
    %231 = vector.extract_strided_slice %21 {offsets = [4, 0, 0], sizes = [1, 1, 128], strides = [1, 1, 1]} : vector<8x1x128xf32> to vector<1x1x128xf32>
    %232 = vector.shape_cast %231 : vector<1x1x128xf32> to vector<1x128xf32>
    %233 = arith.addf %230, %232 : vector<1x128xf32>
    %cst_82 = arith.constant -4.000000e+01 : f32
    %234 = vector.broadcast %cst_82 : f32 to vector<1x128xf32>
    %235 = arith.cmpf oge, %233, %234 : vector<1x128xf32>
    %cst_83 = arith.constant -7.000000e+01 : f32
    %236 = vector.broadcast %cst_83 : f32 to vector<1x128xf32>
    %237 = arith.select %235, %236, %233 : vector<1x128xi1>, vector<1x128xf32>
    %cst_84 = arith.constant -7.000000e+01 : f32
    %238 = vector.broadcast %cst_84 : f32 to vector<1x128xf32>
    %239 = arith.subf %237, %238 : vector<1x128xf32>
    %cst_85 = arith.constant 0.0333333351 : f32
    %240 = vector.broadcast %cst_85 : f32 to vector<1x128xf32>
    %241 = arith.mulf %239, %240 : vector<1x128xf32>
    %242 = arith.index_cast %206 : i32 to index
    %c0_86 = arith.constant 0 : index
    %c0_87 = arith.constant 0 : index
    %243 = vector.load %arg5[%242, %c0_86, %c0_87] : memref<16x1x128xf32, #tpu.memory_space<vmem>>, vector<1x1x128xf32>
    %244 = vector.shape_cast %243 : vector<1x1x128xf32> to vector<1x128xf32>
    %245 = vector.shape_cast %241 : vector<1x128xf32> to vector<1x1x128xf32>
    tpu.vector_store %arg5[%242, %c0_86, %c0_87], %245 {strides = array<i32>} : memref<16x1x128xf32, #tpu.memory_space<vmem>>, vector<1x1x128xf32>,
    %246 = arith.extui %235 : vector<1x128xi1> to vector<1x128xi32>
    %247 = arith.sitofp %246 : vector<1x128xi32> to vector<1x128xf32>
    %248 = arith.index_cast %206 : i32 to index
    %c0_88 = arith.constant 0 : index
    %c0_89 = arith.constant 0 : index
    %249 = vector.load %arg7[%248, %c0_88, %c0_89] : memref<16x1x128xf32, #tpu.memory_space<vmem>>, vector<1x1x128xf32>
    %250 = vector.shape_cast %249 : vector<1x1x128xf32> to vector<1x128xf32>
    %251 = vector.shape_cast %247 : vector<1x128xf32> to vector<1x1x128xf32>
    tpu.vector_store %arg7[%248, %c0_88, %c0_89], %251 {strides = array<i32>} : memref<16x1x128xf32, #tpu.memory_space<vmem>>, vector<1x1x128xf32>,
    %c5_i32 = arith.constant 5 : i32
    %252 = arith.addi %13, %c5_i32 : i32
    %cst_90 = arith.constant 1.000000e-01 : f32
    %253 = vector.broadcast %cst_90 : f32 to vector<1x128xf32>
    %254 = arith.mulf %253, %211 : vector<1x128xf32>
    %255 = vector.extract_strided_slice %17 {offsets = [5, 0, 0], sizes = [1, 1, 128], strides = [1, 1, 1]} : vector<8x1x128xf32> to vector<1x1x128xf32>
    %256 = vector.shape_cast %255 : vector<1x1x128xf32> to vector<1x128xf32>
    %257 = arith.addf %254, %256 : vector<1x128xf32>
    %cst_91 = arith.constant 1.000000e-01 : f32
    %258 = vector.broadcast %cst_91 : f32 to vector<1x128xf32>
    %259 = arith.mulf %258, %224 : vector<1x128xf32>
    %260 = arith.addf %259, %257 : vector<1x128xf32>
    %261 = arith.cmpf ogt, %260, %2 : vector<1x128xf32>
    %262 = arith.extui %261 : vector<1x128xi1> to vector<1x128xi32>
    %263 = arith.sitofp %262 : vector<1x128xi32> to vector<1x128xf32>
    %264 = arith.index_cast %252 : i32 to index
    %c0_92 = arith.constant 0 : index
    %c0_93 = arith.constant 0 : index
    %265 = vector.load %arg6[%264, %c0_92, %c0_93] : memref<16x1x128xf32, #tpu.memory_space<vmem>>, vector<1x1x128xf32>
    %266 = vector.shape_cast %265 : vector<1x1x128xf32> to vector<1x128xf32>
    %267 = vector.shape_cast %263 : vector<1x128xf32> to vector<1x1x128xf32>
    tpu.vector_store %arg6[%264, %c0_92, %c0_93], %267 {strides = array<i32>} : memref<16x1x128xf32, #tpu.memory_space<vmem>>, vector<1x1x128xf32>,
    %268 = arith.subf %260, %2 : vector<1x128xf32>
    %269 = arith.select %261, %268, %260 : vector<1x128xi1>, vector<1x128xf32>
    %270 = math.tanh %269 : vector<1x128xf32>
    %271 = arith.index_cast %252 : i32 to index
    %c0_94 = arith.constant 0 : index
    %c0_95 = arith.constant 0 : index
    %272 = vector.load %arg4[%271, %c0_94, %c0_95] : memref<16x1x128xf32, #tpu.memory_space<vmem>>, vector<1x1x128xf32>
    %273 = vector.shape_cast %272 : vector<1x1x128xf32> to vector<1x128xf32>
    %274 = vector.shape_cast %270 : vector<1x128xf32> to vector<1x1x128xf32>
    tpu.vector_store %arg4[%271, %c0_94, %c0_95], %274 {strides = array<i32>} : memref<16x1x128xf32, #tpu.memory_space<vmem>>, vector<1x1x128xf32>,
    %cst_96 = arith.constant 9.900000e-01 : f32
    %275 = vector.broadcast %cst_96 : f32 to vector<1x128xf32>
    %276 = arith.mulf %275, %237 : vector<1x128xf32>
    %277 = vector.extract_strided_slice %21 {offsets = [5, 0, 0], sizes = [1, 1, 128], strides = [1, 1, 1]} : vector<8x1x128xf32> to vector<1x1x128xf32>
    %278 = vector.shape_cast %277 : vector<1x1x128xf32> to vector<1x128xf32>
    %279 = arith.addf %276, %278 : vector<1x128xf32>
    %cst_97 = arith.constant -4.000000e+01 : f32
    %280 = vector.broadcast %cst_97 : f32 to vector<1x128xf32>
    %281 = arith.cmpf oge, %279, %280 : vector<1x128xf32>
    %cst_98 = arith.constant -7.000000e+01 : f32
    %282 = vector.broadcast %cst_98 : f32 to vector<1x128xf32>
    %283 = arith.select %281, %282, %279 : vector<1x128xi1>, vector<1x128xf32>
    %cst_99 = arith.constant -7.000000e+01 : f32
    %284 = vector.broadcast %cst_99 : f32 to vector<1x128xf32>
    %285 = arith.subf %283, %284 : vector<1x128xf32>
    %cst_100 = arith.constant 0.0333333351 : f32
    %286 = vector.broadcast %cst_100 : f32 to vector<1x128xf32>
    %287 = arith.mulf %285, %286 : vector<1x128xf32>
    %288 = arith.index_cast %252 : i32 to index
    %c0_101 = arith.constant 0 : index
    %c0_102 = arith.constant 0 : index
    %289 = vector.load %arg5[%288, %c0_101, %c0_102] : memref<16x1x128xf32, #tpu.memory_space<vmem>>, vector<1x1x128xf32>
    %290 = vector.shape_cast %289 : vector<1x1x128xf32> to vector<1x128xf32>
    %291 = vector.shape_cast %287 : vector<1x128xf32> to vector<1x1x128xf32>
    tpu.vector_store %arg5[%288, %c0_101, %c0_102], %291 {strides = array<i32>} : memref<16x1x128xf32, #tpu.memory_space<vmem>>, vector<1x1x128xf32>,
    %292 = arith.extui %281 : vector<1x128xi1> to vector<1x128xi32>
    %293 = arith.sitofp %292 : vector<1x128xi32> to vector<1x128xf32>
    %294 = arith.index_cast %252 : i32 to index
    %c0_103 = arith.constant 0 : index
    %c0_104 = arith.constant 0 : index
    %295 = vector.load %arg7[%294, %c0_103, %c0_104] : memref<16x1x128xf32, #tpu.memory_space<vmem>>, vector<1x1x128xf32>
    %296 = vector.shape_cast %295 : vector<1x1x128xf32> to vector<1x128xf32>
    %297 = vector.shape_cast %293 : vector<1x128xf32> to vector<1x1x128xf32>
    tpu.vector_store %arg7[%294, %c0_103, %c0_104], %297 {strides = array<i32>} : memref<16x1x128xf32, #tpu.memory_space<vmem>>, vector<1x1x128xf32>,
    %c6_i32 = arith.constant 6 : i32
    %298 = arith.addi %13, %c6_i32 : i32
    %cst_105 = arith.constant 1.000000e-01 : f32
    %299 = vector.broadcast %cst_105 : f32 to vector<1x128xf32>
    %300 = arith.mulf %299, %257 : vector<1x128xf32>
    %301 = vector.extract_strided_slice %17 {offsets = [6, 0, 0], sizes = [1, 1, 128], strides = [1, 1, 1]} : vector<8x1x128xf32> to vector<1x1x128xf32>
    %302 = vector.shape_cast %301 : vector<1x1x128xf32> to vector<1x128xf32>
    %303 = arith.addf %300, %302 : vector<1x128xf32>
    %cst_106 = arith.constant 1.000000e-01 : f32
    %304 = vector.broadcast %cst_106 : f32 to vector<1x128xf32>
    %305 = arith.mulf %304, %270 : vector<1x128xf32>
    %306 = arith.addf %305, %303 : vector<1x128xf32>
    %307 = arith.cmpf ogt, %306, %2 : vector<1x128xf32>
    %308 = arith.extui %307 : vector<1x128xi1> to vector<1x128xi32>
    %309 = arith.sitofp %308 : vector<1x128xi32> to vector<1x128xf32>
    %310 = arith.index_cast %298 : i32 to index
    %c0_107 = arith.constant 0 : index
    %c0_108 = arith.constant 0 : index
    %311 = vector.load %arg6[%310, %c0_107, %c0_108] : memref<16x1x128xf32, #tpu.memory_space<vmem>>, vector<1x1x128xf32>
    %312 = vector.shape_cast %311 : vector<1x1x128xf32> to vector<1x128xf32>
    %313 = vector.shape_cast %309 : vector<1x128xf32> to vector<1x1x128xf32>
    tpu.vector_store %arg6[%310, %c0_107, %c0_108], %313 {strides = array<i32>} : memref<16x1x128xf32, #tpu.memory_space<vmem>>, vector<1x1x128xf32>,
    %314 = arith.subf %306, %2 : vector<1x128xf32>
    %315 = arith.select %307, %314, %306 : vector<1x128xi1>, vector<1x128xf32>
    %316 = math.tanh %315 : vector<1x128xf32>
    %317 = arith.index_cast %298 : i32 to index
    %c0_109 = arith.constant 0 : index
    %c0_110 = arith.constant 0 : index
    %318 = vector.load %arg4[%317, %c0_109, %c0_110] : memref<16x1x128xf32, #tpu.memory_space<vmem>>, vector<1x1x128xf32>
    %319 = vector.shape_cast %318 : vector<1x1x128xf32> to vector<1x128xf32>
    %320 = vector.shape_cast %316 : vector<1x128xf32> to vector<1x1x128xf32>
    tpu.vector_store %arg4[%317, %c0_109, %c0_110], %320 {strides = array<i32>} : memref<16x1x128xf32, #tpu.memory_space<vmem>>, vector<1x1x128xf32>,
    %cst_111 = arith.constant 9.900000e-01 : f32
    %321 = vector.broadcast %cst_111 : f32 to vector<1x128xf32>
    %322 = arith.mulf %321, %283 : vector<1x128xf32>
    %323 = vector.extract_strided_slice %21 {offsets = [6, 0, 0], sizes = [1, 1, 128], strides = [1, 1, 1]} : vector<8x1x128xf32> to vector<1x1x128xf32>
    %324 = vector.shape_cast %323 : vector<1x1x128xf32> to vector<1x128xf32>
    %325 = arith.addf %322, %324 : vector<1x128xf32>
    %cst_112 = arith.constant -4.000000e+01 : f32
    %326 = vector.broadcast %cst_112 : f32 to vector<1x128xf32>
    %327 = arith.cmpf oge, %325, %326 : vector<1x128xf32>
    %cst_113 = arith.constant -7.000000e+01 : f32
    %328 = vector.broadcast %cst_113 : f32 to vector<1x128xf32>
    %329 = arith.select %327, %328, %325 : vector<1x128xi1>, vector<1x128xf32>
    %cst_114 = arith.constant -7.000000e+01 : f32
    %330 = vector.broadcast %cst_114 : f32 to vector<1x128xf32>
    %331 = arith.subf %329, %330 : vector<1x128xf32>
    %cst_115 = arith.constant 0.0333333351 : f32
    %332 = vector.broadcast %cst_115 : f32 to vector<1x128xf32>
    %333 = arith.mulf %331, %332 : vector<1x128xf32>
    %334 = arith.index_cast %298 : i32 to index
    %c0_116 = arith.constant 0 : index
    %c0_117 = arith.constant 0 : index
    %335 = vector.load %arg5[%334, %c0_116, %c0_117] : memref<16x1x128xf32, #tpu.memory_space<vmem>>, vector<1x1x128xf32>
    %336 = vector.shape_cast %335 : vector<1x1x128xf32> to vector<1x128xf32>
    %337 = vector.shape_cast %333 : vector<1x128xf32> to vector<1x1x128xf32>
    tpu.vector_store %arg5[%334, %c0_116, %c0_117], %337 {strides = array<i32>} : memref<16x1x128xf32, #tpu.memory_space<vmem>>, vector<1x1x128xf32>,
    %338 = arith.extui %327 : vector<1x128xi1> to vector<1x128xi32>
    %339 = arith.sitofp %338 : vector<1x128xi32> to vector<1x128xf32>
    %340 = arith.index_cast %298 : i32 to index
    %c0_118 = arith.constant 0 : index
    %c0_119 = arith.constant 0 : index
    %341 = vector.load %arg7[%340, %c0_118, %c0_119] : memref<16x1x128xf32, #tpu.memory_space<vmem>>, vector<1x1x128xf32>
    %342 = vector.shape_cast %341 : vector<1x1x128xf32> to vector<1x128xf32>
    %343 = vector.shape_cast %339 : vector<1x128xf32> to vector<1x1x128xf32>
    tpu.vector_store %arg7[%340, %c0_118, %c0_119], %343 {strides = array<i32>} : memref<16x1x128xf32, #tpu.memory_space<vmem>>, vector<1x1x128xf32>,
    %c7_i32 = arith.constant 7 : i32
    %344 = arith.addi %13, %c7_i32 : i32
    %cst_120 = arith.constant 1.000000e-01 : f32
    %345 = vector.broadcast %cst_120 : f32 to vector<1x128xf32>
    %346 = arith.mulf %345, %303 : vector<1x128xf32>
    %347 = vector.extract_strided_slice %17 {offsets = [7, 0, 0], sizes = [1, 1, 128], strides = [1, 1, 1]} : vector<8x1x128xf32> to vector<1x1x128xf32>
    %348 = vector.shape_cast %347 : vector<1x1x128xf32> to vector<1x128xf32>
    %349 = arith.addf %346, %348 : vector<1x128xf32>
    %cst_121 = arith.constant 1.000000e-01 : f32
    %350 = vector.broadcast %cst_121 : f32 to vector<1x128xf32>
    %351 = arith.mulf %350, %316 : vector<1x128xf32>
    %352 = arith.addf %351, %349 : vector<1x128xf32>
    %353 = arith.cmpf ogt, %352, %2 : vector<1x128xf32>
    %354 = arith.extui %353 : vector<1x128xi1> to vector<1x128xi32>
    %355 = arith.sitofp %354 : vector<1x128xi32> to vector<1x128xf32>
    %356 = arith.index_cast %344 : i32 to index
    %c0_122 = arith.constant 0 : index
    %c0_123 = arith.constant 0 : index
    %357 = vector.load %arg6[%356, %c0_122, %c0_123] : memref<16x1x128xf32, #tpu.memory_space<vmem>>, vector<1x1x128xf32>
    %358 = vector.shape_cast %357 : vector<1x1x128xf32> to vector<1x128xf32>
    %359 = vector.shape_cast %355 : vector<1x128xf32> to vector<1x1x128xf32>
    tpu.vector_store %arg6[%356, %c0_122, %c0_123], %359 {strides = array<i32>} : memref<16x1x128xf32, #tpu.memory_space<vmem>>, vector<1x1x128xf32>,
    %360 = arith.subf %352, %2 : vector<1x128xf32>
    %361 = arith.select %353, %360, %352 : vector<1x128xi1>, vector<1x128xf32>
    %362 = math.tanh %361 : vector<1x128xf32>
    %363 = arith.index_cast %344 : i32 to index
    %c0_124 = arith.constant 0 : index
    %c0_125 = arith.constant 0 : index
    %364 = vector.load %arg4[%363, %c0_124, %c0_125] : memref<16x1x128xf32, #tpu.memory_space<vmem>>, vector<1x1x128xf32>
    %365 = vector.shape_cast %364 : vector<1x1x128xf32> to vector<1x128xf32>
    %366 = vector.shape_cast %362 : vector<1x128xf32> to vector<1x1x128xf32>
    tpu.vector_store %arg4[%363, %c0_124, %c0_125], %366 {strides = array<i32>} : memref<16x1x128xf32, #tpu.memory_space<vmem>>, vector<1x1x128xf32>,
    %cst_126 = arith.constant 9.900000e-01 : f32
    %367 = vector.broadcast %cst_126 : f32 to vector<1x128xf32>
    %368 = arith.mulf %367, %329 : vector<1x128xf32>
    %369 = vector.extract_strided_slice %21 {offsets = [7, 0, 0], sizes = [1, 1, 128], strides = [1, 1, 1]} : vector<8x1x128xf32> to vector<1x1x128xf32>
    %370 = vector.shape_cast %369 : vector<1x1x128xf32> to vector<1x128xf32>
    %371 = arith.addf %368, %370 : vector<1x128xf32>
    %cst_127 = arith.constant -4.000000e+01 : f32
    %372 = vector.broadcast %cst_127 : f32 to vector<1x128xf32>
    %373 = arith.cmpf oge, %371, %372 : vector<1x128xf32>
    %cst_128 = arith.constant -7.000000e+01 : f32
    %374 = vector.broadcast %cst_128 : f32 to vector<1x128xf32>
    %375 = arith.select %373, %374, %371 : vector<1x128xi1>, vector<1x128xf32>
    %cst_129 = arith.constant -7.000000e+01 : f32
    %376 = vector.broadcast %cst_129 : f32 to vector<1x128xf32>
    %377 = arith.subf %375, %376 : vector<1x128xf32>
    %cst_130 = arith.constant 0.0333333351 : f32
    %378 = vector.broadcast %cst_130 : f32 to vector<1x128xf32>
    %379 = arith.mulf %377, %378 : vector<1x128xf32>
    %380 = arith.index_cast %344 : i32 to index
    %c0_131 = arith.constant 0 : index
    %c0_132 = arith.constant 0 : index
    %381 = vector.load %arg5[%380, %c0_131, %c0_132] : memref<16x1x128xf32, #tpu.memory_space<vmem>>, vector<1x1x128xf32>
    %382 = vector.shape_cast %381 : vector<1x1x128xf32> to vector<1x128xf32>
    %383 = vector.shape_cast %379 : vector<1x128xf32> to vector<1x1x128xf32>
    tpu.vector_store %arg5[%380, %c0_131, %c0_132], %383 {strides = array<i32>} : memref<16x1x128xf32, #tpu.memory_space<vmem>>, vector<1x1x128xf32>,
    %384 = arith.extui %373 : vector<1x128xi1> to vector<1x128xi32>
    %385 = arith.sitofp %384 : vector<1x128xi32> to vector<1x128xf32>
    %386 = arith.index_cast %344 : i32 to index
    %c0_133 = arith.constant 0 : index
    %c0_134 = arith.constant 0 : index
    %387 = vector.load %arg7[%386, %c0_133, %c0_134] : memref<16x1x128xf32, #tpu.memory_space<vmem>>, vector<1x1x128xf32>
    %388 = vector.shape_cast %387 : vector<1x1x128xf32> to vector<1x128xf32>
    %389 = vector.shape_cast %385 : vector<1x128xf32> to vector<1x1x128xf32>
    tpu.vector_store %arg7[%386, %c0_133, %c0_134], %389 {strides = array<i32>} : memref<16x1x128xf32, #tpu.memory_space<vmem>>, vector<1x1x128xf32>,
    %c8_i32_135 = arith.constant 8 : i32
    %390 = arith.muli %10, %c8_i32_135 : i32
    %391 = tpu.assume_multiple %390, 8 : i32
    %392 = arith.index_cast %391 : i32 to index
    %c0_136 = arith.constant 0 : index
    %c0_137 = arith.constant 0 : index
    %393 = vector.load %arg3[%392, %c0_136, %c0_137] : memref<16x1x128xf32, #tpu.memory_space<vmem>>, vector<8x1x128xf32>
    %394 = vector.broadcast %0 : f32 to vector<8x1x128xf32>
    %395 = arith.mulf %393, %394 : vector<8x1x128xf32>
    %cst_138 = arith.constant 1.000000e-01 : f32
    %396 = vector.broadcast %cst_138 : f32 to vector<8x1x128xf32>
    %397 = arith.mulf %393, %396 : vector<8x1x128xf32>
    %cst_139 = arith.constant -0.699999988 : f32
    %398 = vector.broadcast %cst_139 : f32 to vector<8x1x128xf32>
    %399 = arith.addf %397, %398 : vector<8x1x128xf32>
    %c0_i32_140 = arith.constant 0 : i32
    %400 = arith.addi %391, %c0_i32_140 : i32
    %cst_141 = arith.constant 1.000000e-01 : f32
    %401 = vector.broadcast %cst_141 : f32 to vector<1x128xf32>
    %402 = arith.mulf %401, %349 : vector<1x128xf32>
    %403 = vector.extract_strided_slice %395 {offsets = [0, 0, 0], sizes = [1, 1, 128], strides = [1, 1, 1]} : vector<8x1x128xf32> to vector<1x1x128xf32>
    %404 = vector.shape_cast %403 : vector<1x1x128xf32> to vector<1x128xf32>
    %405 = arith.addf %402, %404 : vector<1x128xf32>
    %cst_142 = arith.constant 1.000000e-01 : f32
    %406 = vector.broadcast %cst_142 : f32 to vector<1x128xf32>
    %407 = arith.mulf %406, %362 : vector<1x128xf32>
    %408 = arith.addf %407, %405 : vector<1x128xf32>
    %409 = arith.cmpf ogt, %408, %2 : vector<1x128xf32>
    %410 = arith.extui %409 : vector<1x128xi1> to vector<1x128xi32>
    %411 = arith.sitofp %410 : vector<1x128xi32> to vector<1x128xf32>
    %412 = arith.index_cast %400 : i32 to index
    %c0_143 = arith.constant 0 : index
    %c0_144 = arith.constant 0 : index
    %413 = vector.load %arg6[%412, %c0_143, %c0_144] : memref<16x1x128xf32, #tpu.memory_space<vmem>>, vector<1x1x128xf32>
    %414 = vector.shape_cast %413 : vector<1x1x128xf32> to vector<1x128xf32>
    %415 = vector.shape_cast %411 : vector<1x128xf32> to vector<1x1x128xf32>
    tpu.vector_store %arg6[%412, %c0_143, %c0_144], %415 {strides = array<i32>} : memref<16x1x128xf32, #tpu.memory_space<vmem>>, vector<1x1x128xf32>,
    %416 = arith.subf %408, %2 : vector<1x128xf32>
    %417 = arith.select %409, %416, %408 : vector<1x128xi1>, vector<1x128xf32>
    %418 = math.tanh %417 : vector<1x128xf32>
    %419 = arith.index_cast %400 : i32 to index
    %c0_145 = arith.constant 0 : index
    %c0_146 = arith.constant 0 : index
    %420 = vector.load %arg4[%419, %c0_145, %c0_146] : memref<16x1x128xf32, #tpu.memory_space<vmem>>, vector<1x1x128xf32>
    %421 = vector.shape_cast %420 : vector<1x1x128xf32> to vector<1x128xf32>
    %422 = vector.shape_cast %418 : vector<1x128xf32> to vector<1x1x128xf32>
    tpu.vector_store %arg4[%419, %c0_145, %c0_146], %422 {strides = array<i32>} : memref<16x1x128xf32, #tpu.memory_space<vmem>>, vector<1x1x128xf32>,
    %cst_147 = arith.constant 9.900000e-01 : f32
    %423 = vector.broadcast %cst_147 : f32 to vector<1x128xf32>
    %424 = arith.mulf %423, %375 : vector<1x128xf32>
    %425 = vector.extract_strided_slice %399 {offsets = [0, 0, 0], sizes = [1, 1, 128], strides = [1, 1, 1]} : vector<8x1x128xf32> to vector<1x1x128xf32>
    %426 = vector.shape_cast %425 : vector<1x1x128xf32> to vector<1x128xf32>
    %427 = arith.addf %424, %426 : vector<1x128xf32>
    %cst_148 = arith.constant -4.000000e+01 : f32
    %428 = vector.broadcast %cst_148 : f32 to vector<1x128xf32>
    %429 = arith.cmpf oge, %427, %428 : vector<1x128xf32>
    %cst_149 = arith.constant -7.000000e+01 : f32
    %430 = vector.broadcast %cst_149 : f32 to vector<1x128xf32>
    %431 = arith.select %429, %430, %427 : vector<1x128xi1>, vector<1x128xf32>
    %cst_150 = arith.constant -7.000000e+01 : f32
    %432 = vector.broadcast %cst_150 : f32 to vector<1x128xf32>
    %433 = arith.subf %431, %432 : vector<1x128xf32>
    %cst_151 = arith.constant 0.0333333351 : f32
    %434 = vector.broadcast %cst_151 : f32 to vector<1x128xf32>
    %435 = arith.mulf %433, %434 : vector<1x128xf32>
    %436 = arith.index_cast %400 : i32 to index
    %c0_152 = arith.constant 0 : index
    %c0_153 = arith.constant 0 : index
    %437 = vector.load %arg5[%436, %c0_152, %c0_153] : memref<16x1x128xf32, #tpu.memory_space<vmem>>, vector<1x1x128xf32>
    %438 = vector.shape_cast %437 : vector<1x1x128xf32> to vector<1x128xf32>
    %439 = vector.shape_cast %435 : vector<1x128xf32> to vector<1x1x128xf32>
    tpu.vector_store %arg5[%436, %c0_152, %c0_153], %439 {strides = array<i32>} : memref<16x1x128xf32, #tpu.memory_space<vmem>>, vector<1x1x128xf32>,
    %440 = arith.extui %429 : vector<1x128xi1> to vector<1x128xi32>
    %441 = arith.sitofp %440 : vector<1x128xi32> to vector<1x128xf32>
    %442 = arith.index_cast %400 : i32 to index
    %c0_154 = arith.constant 0 : index
    %c0_155 = arith.constant 0 : index
    %443 = vector.load %arg7[%442, %c0_154, %c0_155] : memref<16x1x128xf32, #tpu.memory_space<vmem>>, vector<1x1x128xf32>
    %444 = vector.shape_cast %443 : vector<1x1x128xf32> to vector<1x128xf32>
    %445 = vector.shape_cast %441 : vector<1x128xf32> to vector<1x1x128xf32>
    tpu.vector_store %arg7[%442, %c0_154, %c0_155], %445 {strides = array<i32>} : memref<16x1x128xf32, #tpu.memory_space<vmem>>, vector<1x1x128xf32>,
    %c1_i32_156 = arith.constant 1 : i32
    %446 = arith.addi %391, %c1_i32_156 : i32
    %cst_157 = arith.constant 1.000000e-01 : f32
    %447 = vector.broadcast %cst_157 : f32 to vector<1x128xf32>
    %448 = arith.mulf %447, %405 : vector<1x128xf32>
    %449 = vector.extract_strided_slice %395 {offsets = [1, 0, 0], sizes = [1, 1, 128], strides = [1, 1, 1]} : vector<8x1x128xf32> to vector<1x1x128xf32>
    %450 = vector.shape_cast %449 : vector<1x1x128xf32> to vector<1x128xf32>
    %451 = arith.addf %448, %450 : vector<1x128xf32>
    %cst_158 = arith.constant 1.000000e-01 : f32
    %452 = vector.broadcast %cst_158 : f32 to vector<1x128xf32>
    %453 = arith.mulf %452, %418 : vector<1x128xf32>
    %454 = arith.addf %453, %451 : vector<1x128xf32>
    %455 = arith.cmpf ogt, %454, %2 : vector<1x128xf32>
    %456 = arith.extui %455 : vector<1x128xi1> to vector<1x128xi32>
    %457 = arith.sitofp %456 : vector<1x128xi32> to vector<1x128xf32>
    %458 = arith.index_cast %446 : i32 to index
    %c0_159 = arith.constant 0 : index
    %c0_160 = arith.constant 0 : index
    %459 = vector.load %arg6[%458, %c0_159, %c0_160] : memref<16x1x128xf32, #tpu.memory_space<vmem>>, vector<1x1x128xf32>
    %460 = vector.shape_cast %459 : vector<1x1x128xf32> to vector<1x128xf32>
    %461 = vector.shape_cast %457 : vector<1x128xf32> to vector<1x1x128xf32>
    tpu.vector_store %arg6[%458, %c0_159, %c0_160], %461 {strides = array<i32>} : memref<16x1x128xf32, #tpu.memory_space<vmem>>, vector<1x1x128xf32>,
    %462 = arith.subf %454, %2 : vector<1x128xf32>
    %463 = arith.select %455, %462, %454 : vector<1x128xi1>, vector<1x128xf32>
    %464 = math.tanh %463 : vector<1x128xf32>
    %465 = arith.index_cast %446 : i32 to index
    %c0_161 = arith.constant 0 : index
    %c0_162 = arith.constant 0 : index
    %466 = vector.load %arg4[%465, %c0_161, %c0_162] : memref<16x1x128xf32, #tpu.memory_space<vmem>>, vector<1x1x128xf32>
    %467 = vector.shape_cast %466 : vector<1x1x128xf32> to vector<1x128xf32>
    %468 = vector.shape_cast %464 : vector<1x128xf32> to vector<1x1x128xf32>
    tpu.vector_store %arg4[%465, %c0_161, %c0_162], %468 {strides = array<i32>} : memref<16x1x128xf32, #tpu.memory_space<vmem>>, vector<1x1x128xf32>,
    %cst_163 = arith.constant 9.900000e-01 : f32
    %469 = vector.broadcast %cst_163 : f32 to vector<1x128xf32>
    %470 = arith.mulf %469, %431 : vector<1x128xf32>
    %471 = vector.extract_strided_slice %399 {offsets = [1, 0, 0], sizes = [1, 1, 128], strides = [1, 1, 1]} : vector<8x1x128xf32> to vector<1x1x128xf32>
    %472 = vector.shape_cast %471 : vector<1x1x128xf32> to vector<1x128xf32>
    %473 = arith.addf %470, %472 : vector<1x128xf32>
    %cst_164 = arith.constant -4.000000e+01 : f32
    %474 = vector.broadcast %cst_164 : f32 to vector<1x128xf32>
    %475 = arith.cmpf oge, %473, %474 : vector<1x128xf32>
    %cst_165 = arith.constant -7.000000e+01 : f32
    %476 = vector.broadcast %cst_165 : f32 to vector<1x128xf32>
    %477 = arith.select %475, %476, %473 : vector<1x128xi1>, vector<1x128xf32>
    %cst_166 = arith.constant -7.000000e+01 : f32
    %478 = vector.broadcast %cst_166 : f32 to vector<1x128xf32>
    %479 = arith.subf %477, %478 : vector<1x128xf32>
    %cst_167 = arith.constant 0.0333333351 : f32
    %480 = vector.broadcast %cst_167 : f32 to vector<1x128xf32>
    %481 = arith.mulf %479, %480 : vector<1x128xf32>
    %482 = arith.index_cast %446 : i32 to index
    %c0_168 = arith.constant 0 : index
    %c0_169 = arith.constant 0 : index
    %483 = vector.load %arg5[%482, %c0_168, %c0_169] : memref<16x1x128xf32, #tpu.memory_space<vmem>>, vector<1x1x128xf32>
    %484 = vector.shape_cast %483 : vector<1x1x128xf32> to vector<1x128xf32>
    %485 = vector.shape_cast %481 : vector<1x128xf32> to vector<1x1x128xf32>
    tpu.vector_store %arg5[%482, %c0_168, %c0_169], %485 {strides = array<i32>} : memref<16x1x128xf32, #tpu.memory_space<vmem>>, vector<1x1x128xf32>,
    %486 = arith.extui %475 : vector<1x128xi1> to vector<1x128xi32>
    %487 = arith.sitofp %486 : vector<1x128xi32> to vector<1x128xf32>
    %488 = arith.index_cast %446 : i32 to index
    %c0_170 = arith.constant 0 : index
    %c0_171 = arith.constant 0 : index
    %489 = vector.load %arg7[%488, %c0_170, %c0_171] : memref<16x1x128xf32, #tpu.memory_space<vmem>>, vector<1x1x128xf32>
    %490 = vector.shape_cast %489 : vector<1x1x128xf32> to vector<1x128xf32>
    %491 = vector.shape_cast %487 : vector<1x128xf32> to vector<1x1x128xf32>
    tpu.vector_store %arg7[%488, %c0_170, %c0_171], %491 {strides = array<i32>} : memref<16x1x128xf32, #tpu.memory_space<vmem>>, vector<1x1x128xf32>,
    %c2_i32_172 = arith.constant 2 : i32
    %492 = arith.addi %391, %c2_i32_172 : i32
    %cst_173 = arith.constant 1.000000e-01 : f32
    %493 = vector.broadcast %cst_173 : f32 to vector<1x128xf32>
    %494 = arith.mulf %493, %451 : vector<1x128xf32>
    %495 = vector.extract_strided_slice %395 {offsets = [2, 0, 0], sizes = [1, 1, 128], strides = [1, 1, 1]} : vector<8x1x128xf32> to vector<1x1x128xf32>
    %496 = vector.shape_cast %495 : vector<1x1x128xf32> to vector<1x128xf32>
    %497 = arith.addf %494, %496 : vector<1x128xf32>
    %cst_174 = arith.constant 1.000000e-01 : f32
    %498 = vector.broadcast %cst_174 : f32 to vector<1x128xf32>
    %499 = arith.mulf %498, %464 : vector<1x128xf32>
    %500 = arith.addf %499, %497 : vector<1x128xf32>
    %501 = arith.cmpf ogt, %500, %2 : vector<1x128xf32>
    %502 = arith.extui %501 : vector<1x128xi1> to vector<1x128xi32>
    %503 = arith.sitofp %502 : vector<1x128xi32> to vector<1x128xf32>
    %504 = arith.index_cast %492 : i32 to index
    %c0_175 = arith.constant 0 : index
    %c0_176 = arith.constant 0 : index
    %505 = vector.load %arg6[%504, %c0_175, %c0_176] : memref<16x1x128xf32, #tpu.memory_space<vmem>>, vector<1x1x128xf32>
    %506 = vector.shape_cast %505 : vector<1x1x128xf32> to vector<1x128xf32>
    %507 = vector.shape_cast %503 : vector<1x128xf32> to vector<1x1x128xf32>
    tpu.vector_store %arg6[%504, %c0_175, %c0_176], %507 {strides = array<i32>} : memref<16x1x128xf32, #tpu.memory_space<vmem>>, vector<1x1x128xf32>,
    %508 = arith.subf %500, %2 : vector<1x128xf32>
    %509 = arith.select %501, %508, %500 : vector<1x128xi1>, vector<1x128xf32>
    %510 = math.tanh %509 : vector<1x128xf32>
    %511 = arith.index_cast %492 : i32 to index
    %c0_177 = arith.constant 0 : index
    %c0_178 = arith.constant 0 : index
    %512 = vector.load %arg4[%511, %c0_177, %c0_178] : memref<16x1x128xf32, #tpu.memory_space<vmem>>, vector<1x1x128xf32>
    %513 = vector.shape_cast %512 : vector<1x1x128xf32> to vector<1x128xf32>
    %514 = vector.shape_cast %510 : vector<1x128xf32> to vector<1x1x128xf32>
    tpu.vector_store %arg4[%511, %c0_177, %c0_178], %514 {strides = array<i32>} : memref<16x1x128xf32, #tpu.memory_space<vmem>>, vector<1x1x128xf32>,
    %cst_179 = arith.constant 9.900000e-01 : f32
    %515 = vector.broadcast %cst_179 : f32 to vector<1x128xf32>
    %516 = arith.mulf %515, %477 : vector<1x128xf32>
    %517 = vector.extract_strided_slice %399 {offsets = [2, 0, 0], sizes = [1, 1, 128], strides = [1, 1, 1]} : vector<8x1x128xf32> to vector<1x1x128xf32>
    %518 = vector.shape_cast %517 : vector<1x1x128xf32> to vector<1x128xf32>
    %519 = arith.addf %516, %518 : vector<1x128xf32>
    %cst_180 = arith.constant -4.000000e+01 : f32
    %520 = vector.broadcast %cst_180 : f32 to vector<1x128xf32>
    %521 = arith.cmpf oge, %519, %520 : vector<1x128xf32>
    %cst_181 = arith.constant -7.000000e+01 : f32
    %522 = vector.broadcast %cst_181 : f32 to vector<1x128xf32>
    %523 = arith.select %521, %522, %519 : vector<1x128xi1>, vector<1x128xf32>
    %cst_182 = arith.constant -7.000000e+01 : f32
    %524 = vector.broadcast %cst_182 : f32 to vector<1x128xf32>
    %525 = arith.subf %523, %524 : vector<1x128xf32>
    %cst_183 = arith.constant 0.0333333351 : f32
    %526 = vector.broadcast %cst_183 : f32 to vector<1x128xf32>
    %527 = arith.mulf %525, %526 : vector<1x128xf32>
    %528 = arith.index_cast %492 : i32 to index
    %c0_184 = arith.constant 0 : index
    %c0_185 = arith.constant 0 : index
    %529 = vector.load %arg5[%528, %c0_184, %c0_185] : memref<16x1x128xf32, #tpu.memory_space<vmem>>, vector<1x1x128xf32>
    %530 = vector.shape_cast %529 : vector<1x1x128xf32> to vector<1x128xf32>
    %531 = vector.shape_cast %527 : vector<1x128xf32> to vector<1x1x128xf32>
    tpu.vector_store %arg5[%528, %c0_184, %c0_185], %531 {strides = array<i32>} : memref<16x1x128xf32, #tpu.memory_space<vmem>>, vector<1x1x128xf32>,
    %532 = arith.extui %521 : vector<1x128xi1> to vector<1x128xi32>
    %533 = arith.sitofp %532 : vector<1x128xi32> to vector<1x128xf32>
    %534 = arith.index_cast %492 : i32 to index
    %c0_186 = arith.constant 0 : index
    %c0_187 = arith.constant 0 : index
    %535 = vector.load %arg7[%534, %c0_186, %c0_187] : memref<16x1x128xf32, #tpu.memory_space<vmem>>, vector<1x1x128xf32>
    %536 = vector.shape_cast %535 : vector<1x1x128xf32> to vector<1x128xf32>
    %537 = vector.shape_cast %533 : vector<1x128xf32> to vector<1x1x128xf32>
    tpu.vector_store %arg7[%534, %c0_186, %c0_187], %537 {strides = array<i32>} : memref<16x1x128xf32, #tpu.memory_space<vmem>>, vector<1x1x128xf32>,
    %c3_i32_188 = arith.constant 3 : i32
    %538 = arith.addi %391, %c3_i32_188 : i32
    %cst_189 = arith.constant 1.000000e-01 : f32
    %539 = vector.broadcast %cst_189 : f32 to vector<1x128xf32>
    %540 = arith.mulf %539, %497 : vector<1x128xf32>
    %541 = vector.extract_strided_slice %395 {offsets = [3, 0, 0], sizes = [1, 1, 128], strides = [1, 1, 1]} : vector<8x1x128xf32> to vector<1x1x128xf32>
    %542 = vector.shape_cast %541 : vector<1x1x128xf32> to vector<1x128xf32>
    %543 = arith.addf %540, %542 : vector<1x128xf32>
    %cst_190 = arith.constant 1.000000e-01 : f32
    %544 = vector.broadcast %cst_190 : f32 to vector<1x128xf32>
    %545 = arith.mulf %544, %510 : vector<1x128xf32>
    %546 = arith.addf %545, %543 : vector<1x128xf32>
    %547 = arith.cmpf ogt, %546, %2 : vector<1x128xf32>
    %548 = arith.extui %547 : vector<1x128xi1> to vector<1x128xi32>
    %549 = arith.sitofp %548 : vector<1x128xi32> to vector<1x128xf32>
    %550 = arith.index_cast %538 : i32 to index
    %c0_191 = arith.constant 0 : index
    %c0_192 = arith.constant 0 : index
    %551 = vector.load %arg6[%550, %c0_191, %c0_192] : memref<16x1x128xf32, #tpu.memory_space<vmem>>, vector<1x1x128xf32>
    %552 = vector.shape_cast %551 : vector<1x1x128xf32> to vector<1x128xf32>
    %553 = vector.shape_cast %549 : vector<1x128xf32> to vector<1x1x128xf32>
    tpu.vector_store %arg6[%550, %c0_191, %c0_192], %553 {strides = array<i32>} : memref<16x1x128xf32, #tpu.memory_space<vmem>>, vector<1x1x128xf32>,
    %554 = arith.subf %546, %2 : vector<1x128xf32>
    %555 = arith.select %547, %554, %546 : vector<1x128xi1>, vector<1x128xf32>
    %556 = math.tanh %555 : vector<1x128xf32>
    %557 = arith.index_cast %538 : i32 to index
    %c0_193 = arith.constant 0 : index
    %c0_194 = arith.constant 0 : index
    %558 = vector.load %arg4[%557, %c0_193, %c0_194] : memref<16x1x128xf32, #tpu.memory_space<vmem>>, vector<1x1x128xf32>
    %559 = vector.shape_cast %558 : vector<1x1x128xf32> to vector<1x128xf32>
    %560 = vector.shape_cast %556 : vector<1x128xf32> to vector<1x1x128xf32>
    tpu.vector_store %arg4[%557, %c0_193, %c0_194], %560 {strides = array<i32>} : memref<16x1x128xf32, #tpu.memory_space<vmem>>, vector<1x1x128xf32>,
    %cst_195 = arith.constant 9.900000e-01 : f32
    %561 = vector.broadcast %cst_195 : f32 to vector<1x128xf32>
    %562 = arith.mulf %561, %523 : vector<1x128xf32>
    %563 = vector.extract_strided_slice %399 {offsets = [3, 0, 0], sizes = [1, 1, 128], strides = [1, 1, 1]} : vector<8x1x128xf32> to vector<1x1x128xf32>
    %564 = vector.shape_cast %563 : vector<1x1x128xf32> to vector<1x128xf32>
    %565 = arith.addf %562, %564 : vector<1x128xf32>
    %cst_196 = arith.constant -4.000000e+01 : f32
    %566 = vector.broadcast %cst_196 : f32 to vector<1x128xf32>
    %567 = arith.cmpf oge, %565, %566 : vector<1x128xf32>
    %cst_197 = arith.constant -7.000000e+01 : f32
    %568 = vector.broadcast %cst_197 : f32 to vector<1x128xf32>
    %569 = arith.select %567, %568, %565 : vector<1x128xi1>, vector<1x128xf32>
    %cst_198 = arith.constant -7.000000e+01 : f32
    %570 = vector.broadcast %cst_198 : f32 to vector<1x128xf32>
    %571 = arith.subf %569, %570 : vector<1x128xf32>
    %cst_199 = arith.constant 0.0333333351 : f32
    %572 = vector.broadcast %cst_199 : f32 to vector<1x128xf32>
    %573 = arith.mulf %571, %572 : vector<1x128xf32>
    %574 = arith.index_cast %538 : i32 to index
    %c0_200 = arith.constant 0 : index
    %c0_201 = arith.constant 0 : index
    %575 = vector.load %arg5[%574, %c0_200, %c0_201] : memref<16x1x128xf32, #tpu.memory_space<vmem>>, vector<1x1x128xf32>
    %576 = vector.shape_cast %575 : vector<1x1x128xf32> to vector<1x128xf32>
    %577 = vector.shape_cast %573 : vector<1x128xf32> to vector<1x1x128xf32>
    tpu.vector_store %arg5[%574, %c0_200, %c0_201], %577 {strides = array<i32>} : memref<16x1x128xf32, #tpu.memory_space<vmem>>, vector<1x1x128xf32>,
    %578 = arith.extui %567 : vector<1x128xi1> to vector<1x128xi32>
    %579 = arith.sitofp %578 : vector<1x128xi32> to vector<1x128xf32>
    %580 = arith.index_cast %538 : i32 to index
    %c0_202 = arith.constant 0 : index
    %c0_203 = arith.constant 0 : index
    %581 = vector.load %arg7[%580, %c0_202, %c0_203] : memref<16x1x128xf32, #tpu.memory_space<vmem>>, vector<1x1x128xf32>
    %582 = vector.shape_cast %581 : vector<1x1x128xf32> to vector<1x128xf32>
    %583 = vector.shape_cast %579 : vector<1x128xf32> to vector<1x1x128xf32>
    tpu.vector_store %arg7[%580, %c0_202, %c0_203], %583 {strides = array<i32>} : memref<16x1x128xf32, #tpu.memory_space<vmem>>, vector<1x1x128xf32>,
    %c4_i32_204 = arith.constant 4 : i32
    %584 = arith.addi %391, %c4_i32_204 : i32
    %cst_205 = arith.constant 1.000000e-01 : f32
    %585 = vector.broadcast %cst_205 : f32 to vector<1x128xf32>
    %586 = arith.mulf %585, %543 : vector<1x128xf32>
    %587 = vector.extract_strided_slice %395 {offsets = [4, 0, 0], sizes = [1, 1, 128], strides = [1, 1, 1]} : vector<8x1x128xf32> to vector<1x1x128xf32>
    %588 = vector.shape_cast %587 : vector<1x1x128xf32> to vector<1x128xf32>
    %589 = arith.addf %586, %588 : vector<1x128xf32>
    %cst_206 = arith.constant 1.000000e-01 : f32
    %590 = vector.broadcast %cst_206 : f32 to vector<1x128xf32>
    %591 = arith.mulf %590, %556 : vector<1x128xf32>
    %592 = arith.addf %591, %589 : vector<1x128xf32>
    %593 = arith.cmpf ogt, %592, %2 : vector<1x128xf32>
    %594 = arith.extui %593 : vector<1x128xi1> to vector<1x128xi32>
    %595 = arith.sitofp %594 : vector<1x128xi32> to vector<1x128xf32>
    %596 = arith.index_cast %584 : i32 to index
    %c0_207 = arith.constant 0 : index
    %c0_208 = arith.constant 0 : index
    %597 = vector.load %arg6[%596, %c0_207, %c0_208] : memref<16x1x128xf32, #tpu.memory_space<vmem>>, vector<1x1x128xf32>
    %598 = vector.shape_cast %597 : vector<1x1x128xf32> to vector<1x128xf32>
    %599 = vector.shape_cast %595 : vector<1x128xf32> to vector<1x1x128xf32>
    tpu.vector_store %arg6[%596, %c0_207, %c0_208], %599 {strides = array<i32>} : memref<16x1x128xf32, #tpu.memory_space<vmem>>, vector<1x1x128xf32>,
    %600 = arith.subf %592, %2 : vector<1x128xf32>
    %601 = arith.select %593, %600, %592 : vector<1x128xi1>, vector<1x128xf32>
    %602 = math.tanh %601 : vector<1x128xf32>
    %603 = arith.index_cast %584 : i32 to index
    %c0_209 = arith.constant 0 : index
    %c0_210 = arith.constant 0 : index
    %604 = vector.load %arg4[%603, %c0_209, %c0_210] : memref<16x1x128xf32, #tpu.memory_space<vmem>>, vector<1x1x128xf32>
    %605 = vector.shape_cast %604 : vector<1x1x128xf32> to vector<1x128xf32>
    %606 = vector.shape_cast %602 : vector<1x128xf32> to vector<1x1x128xf32>
    tpu.vector_store %arg4[%603, %c0_209, %c0_210], %606 {strides = array<i32>} : memref<16x1x128xf32, #tpu.memory_space<vmem>>, vector<1x1x128xf32>,
    %cst_211 = arith.constant 9.900000e-01 : f32
    %607 = vector.broadcast %cst_211 : f32 to vector<1x128xf32>
    %608 = arith.mulf %607, %569 : vector<1x128xf32>
    %609 = vector.extract_strided_slice %399 {offsets = [4, 0, 0], sizes = [1, 1, 128], strides = [1, 1, 1]} : vector<8x1x128xf32> to vector<1x1x128xf32>
    %610 = vector.shape_cast %609 : vector<1x1x128xf32> to vector<1x128xf32>
    %611 = arith.addf %608, %610 : vector<1x128xf32>
    %cst_212 = arith.constant -4.000000e+01 : f32
    %612 = vector.broadcast %cst_212 : f32 to vector<1x128xf32>
    %613 = arith.cmpf oge, %611, %612 : vector<1x128xf32>
    %cst_213 = arith.constant -7.000000e+01 : f32
    %614 = vector.broadcast %cst_213 : f32 to vector<1x128xf32>
    %615 = arith.select %613, %614, %611 : vector<1x128xi1>, vector<1x128xf32>
    %cst_214 = arith.constant -7.000000e+01 : f32
    %616 = vector.broadcast %cst_214 : f32 to vector<1x128xf32>
    %617 = arith.subf %615, %616 : vector<1x128xf32>
    %cst_215 = arith.constant 0.0333333351 : f32
    %618 = vector.broadcast %cst_215 : f32 to vector<1x128xf32>
    %619 = arith.mulf %617, %618 : vector<1x128xf32>
    %620 = arith.index_cast %584 : i32 to index
    %c0_216 = arith.constant 0 : index
    %c0_217 = arith.constant 0 : index
    %621 = vector.load %arg5[%620, %c0_216, %c0_217] : memref<16x1x128xf32, #tpu.memory_space<vmem>>, vector<1x1x128xf32>
    %622 = vector.shape_cast %621 : vector<1x1x128xf32> to vector<1x128xf32>
    %623 = vector.shape_cast %619 : vector<1x128xf32> to vector<1x1x128xf32>
    tpu.vector_store %arg5[%620, %c0_216, %c0_217], %623 {strides = array<i32>} : memref<16x1x128xf32, #tpu.memory_space<vmem>>, vector<1x1x128xf32>,
    %624 = arith.extui %613 : vector<1x128xi1> to vector<1x128xi32>
    %625 = arith.sitofp %624 : vector<1x128xi32> to vector<1x128xf32>
    %626 = arith.index_cast %584 : i32 to index
    %c0_218 = arith.constant 0 : index
    %c0_219 = arith.constant 0 : index
    %627 = vector.load %arg7[%626, %c0_218, %c0_219] : memref<16x1x128xf32, #tpu.memory_space<vmem>>, vector<1x1x128xf32>
    %628 = vector.shape_cast %627 : vector<1x1x128xf32> to vector<1x128xf32>
    %629 = vector.shape_cast %625 : vector<1x128xf32> to vector<1x1x128xf32>
    tpu.vector_store %arg7[%626, %c0_218, %c0_219], %629 {strides = array<i32>} : memref<16x1x128xf32, #tpu.memory_space<vmem>>, vector<1x1x128xf32>,
    %c5_i32_220 = arith.constant 5 : i32
    %630 = arith.addi %391, %c5_i32_220 : i32
    %cst_221 = arith.constant 1.000000e-01 : f32
    %631 = vector.broadcast %cst_221 : f32 to vector<1x128xf32>
    %632 = arith.mulf %631, %589 : vector<1x128xf32>
    %633 = vector.extract_strided_slice %395 {offsets = [5, 0, 0], sizes = [1, 1, 128], strides = [1, 1, 1]} : vector<8x1x128xf32> to vector<1x1x128xf32>
    %634 = vector.shape_cast %633 : vector<1x1x128xf32> to vector<1x128xf32>
    %635 = arith.addf %632, %634 : vector<1x128xf32>
    %cst_222 = arith.constant 1.000000e-01 : f32
    %636 = vector.broadcast %cst_222 : f32 to vector<1x128xf32>
    %637 = arith.mulf %636, %602 : vector<1x128xf32>
    %638 = arith.addf %637, %635 : vector<1x128xf32>
    %639 = arith.cmpf ogt, %638, %2 : vector<1x128xf32>
    %640 = arith.extui %639 : vector<1x128xi1> to vector<1x128xi32>
    %641 = arith.sitofp %640 : vector<1x128xi32> to vector<1x128xf32>
    %642 = arith.index_cast %630 : i32 to index
    %c0_223 = arith.constant 0 : index
    %c0_224 = arith.constant 0 : index
    %643 = vector.load %arg6[%642, %c0_223, %c0_224] : memref<16x1x128xf32, #tpu.memory_space<vmem>>, vector<1x1x128xf32>
    %644 = vector.shape_cast %643 : vector<1x1x128xf32> to vector<1x128xf32>
    %645 = vector.shape_cast %641 : vector<1x128xf32> to vector<1x1x128xf32>
    tpu.vector_store %arg6[%642, %c0_223, %c0_224], %645 {strides = array<i32>} : memref<16x1x128xf32, #tpu.memory_space<vmem>>, vector<1x1x128xf32>,
    %646 = arith.subf %638, %2 : vector<1x128xf32>
    %647 = arith.select %639, %646, %638 : vector<1x128xi1>, vector<1x128xf32>
    %648 = math.tanh %647 : vector<1x128xf32>
    %649 = arith.index_cast %630 : i32 to index
    %c0_225 = arith.constant 0 : index
    %c0_226 = arith.constant 0 : index
    %650 = vector.load %arg4[%649, %c0_225, %c0_226] : memref<16x1x128xf32, #tpu.memory_space<vmem>>, vector<1x1x128xf32>
    %651 = vector.shape_cast %650 : vector<1x1x128xf32> to vector<1x128xf32>
    %652 = vector.shape_cast %648 : vector<1x128xf32> to vector<1x1x128xf32>
    tpu.vector_store %arg4[%649, %c0_225, %c0_226], %652 {strides = array<i32>} : memref<16x1x128xf32, #tpu.memory_space<vmem>>, vector<1x1x128xf32>,
    %cst_227 = arith.constant 9.900000e-01 : f32
    %653 = vector.broadcast %cst_227 : f32 to vector<1x128xf32>
    %654 = arith.mulf %653, %615 : vector<1x128xf32>
    %655 = vector.extract_strided_slice %399 {offsets = [5, 0, 0], sizes = [1, 1, 128], strides = [1, 1, 1]} : vector<8x1x128xf32> to vector<1x1x128xf32>
    %656 = vector.shape_cast %655 : vector<1x1x128xf32> to vector<1x128xf32>
    %657 = arith.addf %654, %656 : vector<1x128xf32>
    %cst_228 = arith.constant -4.000000e+01 : f32
    %658 = vector.broadcast %cst_228 : f32 to vector<1x128xf32>
    %659 = arith.cmpf oge, %657, %658 : vector<1x128xf32>
    %cst_229 = arith.constant -7.000000e+01 : f32
    %660 = vector.broadcast %cst_229 : f32 to vector<1x128xf32>
    %661 = arith.select %659, %660, %657 : vector<1x128xi1>, vector<1x128xf32>
    %cst_230 = arith.constant -7.000000e+01 : f32
    %662 = vector.broadcast %cst_230 : f32 to vector<1x128xf32>
    %663 = arith.subf %661, %662 : vector<1x128xf32>
    %cst_231 = arith.constant 0.0333333351 : f32
    %664 = vector.broadcast %cst_231 : f32 to vector<1x128xf32>
    %665 = arith.mulf %663, %664 : vector<1x128xf32>
    %666 = arith.index_cast %630 : i32 to index
    %c0_232 = arith.constant 0 : index
    %c0_233 = arith.constant 0 : index
    %667 = vector.load %arg5[%666, %c0_232, %c0_233] : memref<16x1x128xf32, #tpu.memory_space<vmem>>, vector<1x1x128xf32>
    %668 = vector.shape_cast %667 : vector<1x1x128xf32> to vector<1x128xf32>
    %669 = vector.shape_cast %665 : vector<1x128xf32> to vector<1x1x128xf32>
    tpu.vector_store %arg5[%666, %c0_232, %c0_233], %669 {strides = array<i32>} : memref<16x1x128xf32, #tpu.memory_space<vmem>>, vector<1x1x128xf32>,
    %670 = arith.extui %659 : vector<1x128xi1> to vector<1x128xi32>
    %671 = arith.sitofp %670 : vector<1x128xi32> to vector<1x128xf32>
    %672 = arith.index_cast %630 : i32 to index
    %c0_234 = arith.constant 0 : index
    %c0_235 = arith.constant 0 : index
    %673 = vector.load %arg7[%672, %c0_234, %c0_235] : memref<16x1x128xf32, #tpu.memory_space<vmem>>, vector<1x1x128xf32>
    %674 = vector.shape_cast %673 : vector<1x1x128xf32> to vector<1x128xf32>
    %675 = vector.shape_cast %671 : vector<1x128xf32> to vector<1x1x128xf32>
    tpu.vector_store %arg7[%672, %c0_234, %c0_235], %675 {strides = array<i32>} : memref<16x1x128xf32, #tpu.memory_space<vmem>>, vector<1x1x128xf32>,
    %c6_i32_236 = arith.constant 6 : i32
    %676 = arith.addi %391, %c6_i32_236 : i32
    %cst_237 = arith.constant 1.000000e-01 : f32
    %677 = vector.broadcast %cst_237 : f32 to vector<1x128xf32>
    %678 = arith.mulf %677, %635 : vector<1x128xf32>
    %679 = vector.extract_strided_slice %395 {offsets = [6, 0, 0], sizes = [1, 1, 128], strides = [1, 1, 1]} : vector<8x1x128xf32> to vector<1x1x128xf32>
    %680 = vector.shape_cast %679 : vector<1x1x128xf32> to vector<1x128xf32>
    %681 = arith.addf %678, %680 : vector<1x128xf32>
    %cst_238 = arith.constant 1.000000e-01 : f32
    %682 = vector.broadcast %cst_238 : f32 to vector<1x128xf32>
    %683 = arith.mulf %682, %648 : vector<1x128xf32>
    %684 = arith.addf %683, %681 : vector<1x128xf32>
    %685 = arith.cmpf ogt, %684, %2 : vector<1x128xf32>
    %686 = arith.extui %685 : vector<1x128xi1> to vector<1x128xi32>
    %687 = arith.sitofp %686 : vector<1x128xi32> to vector<1x128xf32>
    %688 = arith.index_cast %676 : i32 to index
    %c0_239 = arith.constant 0 : index
    %c0_240 = arith.constant 0 : index
    %689 = vector.load %arg6[%688, %c0_239, %c0_240] : memref<16x1x128xf32, #tpu.memory_space<vmem>>, vector<1x1x128xf32>
    %690 = vector.shape_cast %689 : vector<1x1x128xf32> to vector<1x128xf32>
    %691 = vector.shape_cast %687 : vector<1x128xf32> to vector<1x1x128xf32>
    tpu.vector_store %arg6[%688, %c0_239, %c0_240], %691 {strides = array<i32>} : memref<16x1x128xf32, #tpu.memory_space<vmem>>, vector<1x1x128xf32>,
    %692 = arith.subf %684, %2 : vector<1x128xf32>
    %693 = arith.select %685, %692, %684 : vector<1x128xi1>, vector<1x128xf32>
    %694 = math.tanh %693 : vector<1x128xf32>
    %695 = arith.index_cast %676 : i32 to index
    %c0_241 = arith.constant 0 : index
    %c0_242 = arith.constant 0 : index
    %696 = vector.load %arg4[%695, %c0_241, %c0_242] : memref<16x1x128xf32, #tpu.memory_space<vmem>>, vector<1x1x128xf32>
    %697 = vector.shape_cast %696 : vector<1x1x128xf32> to vector<1x128xf32>
    %698 = vector.shape_cast %694 : vector<1x128xf32> to vector<1x1x128xf32>
    tpu.vector_store %arg4[%695, %c0_241, %c0_242], %698 {strides = array<i32>} : memref<16x1x128xf32, #tpu.memory_space<vmem>>, vector<1x1x128xf32>,
    %cst_243 = arith.constant 9.900000e-01 : f32
    %699 = vector.broadcast %cst_243 : f32 to vector<1x128xf32>
    %700 = arith.mulf %699, %661 : vector<1x128xf32>
    %701 = vector.extract_strided_slice %399 {offsets = [6, 0, 0], sizes = [1, 1, 128], strides = [1, 1, 1]} : vector<8x1x128xf32> to vector<1x1x128xf32>
    %702 = vector.shape_cast %701 : vector<1x1x128xf32> to vector<1x128xf32>
    %703 = arith.addf %700, %702 : vector<1x128xf32>
    %cst_244 = arith.constant -4.000000e+01 : f32
    %704 = vector.broadcast %cst_244 : f32 to vector<1x128xf32>
    %705 = arith.cmpf oge, %703, %704 : vector<1x128xf32>
    %cst_245 = arith.constant -7.000000e+01 : f32
    %706 = vector.broadcast %cst_245 : f32 to vector<1x128xf32>
    %707 = arith.select %705, %706, %703 : vector<1x128xi1>, vector<1x128xf32>
    %cst_246 = arith.constant -7.000000e+01 : f32
    %708 = vector.broadcast %cst_246 : f32 to vector<1x128xf32>
    %709 = arith.subf %707, %708 : vector<1x128xf32>
    %cst_247 = arith.constant 0.0333333351 : f32
    %710 = vector.broadcast %cst_247 : f32 to vector<1x128xf32>
    %711 = arith.mulf %709, %710 : vector<1x128xf32>
    %712 = arith.index_cast %676 : i32 to index
    %c0_248 = arith.constant 0 : index
    %c0_249 = arith.constant 0 : index
    %713 = vector.load %arg5[%712, %c0_248, %c0_249] : memref<16x1x128xf32, #tpu.memory_space<vmem>>, vector<1x1x128xf32>
    %714 = vector.shape_cast %713 : vector<1x1x128xf32> to vector<1x128xf32>
    %715 = vector.shape_cast %711 : vector<1x128xf32> to vector<1x1x128xf32>
    tpu.vector_store %arg5[%712, %c0_248, %c0_249], %715 {strides = array<i32>} : memref<16x1x128xf32, #tpu.memory_space<vmem>>, vector<1x1x128xf32>,
    %716 = arith.extui %705 : vector<1x128xi1> to vector<1x128xi32>
    %717 = arith.sitofp %716 : vector<1x128xi32> to vector<1x128xf32>
    %718 = arith.index_cast %676 : i32 to index
    %c0_250 = arith.constant 0 : index
    %c0_251 = arith.constant 0 : index
    %719 = vector.load %arg7[%718, %c0_250, %c0_251] : memref<16x1x128xf32, #tpu.memory_space<vmem>>, vector<1x1x128xf32>
    %720 = vector.shape_cast %719 : vector<1x1x128xf32> to vector<1x128xf32>
    %721 = vector.shape_cast %717 : vector<1x128xf32> to vector<1x1x128xf32>
    tpu.vector_store %arg7[%718, %c0_250, %c0_251], %721 {strides = array<i32>} : memref<16x1x128xf32, #tpu.memory_space<vmem>>, vector<1x1x128xf32>,
    %c7_i32_252 = arith.constant 7 : i32
    %722 = arith.addi %391, %c7_i32_252 : i32
    %cst_253 = arith.constant 1.000000e-01 : f32
    %723 = vector.broadcast %cst_253 : f32 to vector<1x128xf32>
    %724 = arith.mulf %723, %681 : vector<1x128xf32>
    %725 = vector.extract_strided_slice %395 {offsets = [7, 0, 0], sizes = [1, 1, 128], strides = [1, 1, 1]} : vector<8x1x128xf32> to vector<1x1x128xf32>
    %726 = vector.shape_cast %725 : vector<1x1x128xf32> to vector<1x128xf32>
    %727 = arith.addf %724, %726 : vector<1x128xf32>
    %cst_254 = arith.constant 1.000000e-01 : f32
    %728 = vector.broadcast %cst_254 : f32 to vector<1x128xf32>
    %729 = arith.mulf %728, %694 : vector<1x128xf32>
    %730 = arith.addf %729, %727 : vector<1x128xf32>
    %731 = arith.cmpf ogt, %730, %2 : vector<1x128xf32>
    %732 = arith.extui %731 : vector<1x128xi1> to vector<1x128xi32>
    %733 = arith.sitofp %732 : vector<1x128xi32> to vector<1x128xf32>
    %734 = arith.index_cast %722 : i32 to index
    %c0_255 = arith.constant 0 : index
    %c0_256 = arith.constant 0 : index
    %735 = vector.load %arg6[%734, %c0_255, %c0_256] : memref<16x1x128xf32, #tpu.memory_space<vmem>>, vector<1x1x128xf32>
    %736 = vector.shape_cast %735 : vector<1x1x128xf32> to vector<1x128xf32>
    %737 = vector.shape_cast %733 : vector<1x128xf32> to vector<1x1x128xf32>
    tpu.vector_store %arg6[%734, %c0_255, %c0_256], %737 {strides = array<i32>} : memref<16x1x128xf32, #tpu.memory_space<vmem>>, vector<1x1x128xf32>,
    %738 = arith.subf %730, %2 : vector<1x128xf32>
    %739 = arith.select %731, %738, %730 : vector<1x128xi1>, vector<1x128xf32>
    %740 = math.tanh %739 : vector<1x128xf32>
    %741 = arith.index_cast %722 : i32 to index
    %c0_257 = arith.constant 0 : index
    %c0_258 = arith.constant 0 : index
    %742 = vector.load %arg4[%741, %c0_257, %c0_258] : memref<16x1x128xf32, #tpu.memory_space<vmem>>, vector<1x1x128xf32>
    %743 = vector.shape_cast %742 : vector<1x1x128xf32> to vector<1x128xf32>
    %744 = vector.shape_cast %740 : vector<1x128xf32> to vector<1x1x128xf32>
    tpu.vector_store %arg4[%741, %c0_257, %c0_258], %744 {strides = array<i32>} : memref<16x1x128xf32, #tpu.memory_space<vmem>>, vector<1x1x128xf32>,
    %cst_259 = arith.constant 9.900000e-01 : f32
    %745 = vector.broadcast %cst_259 : f32 to vector<1x128xf32>
    %746 = arith.mulf %745, %707 : vector<1x128xf32>
    %747 = vector.extract_strided_slice %399 {offsets = [7, 0, 0], sizes = [1, 1, 128], strides = [1, 1, 1]} : vector<8x1x128xf32> to vector<1x1x128xf32>
    %748 = vector.shape_cast %747 : vector<1x1x128xf32> to vector<1x128xf32>
    %749 = arith.addf %746, %748 : vector<1x128xf32>
    %cst_260 = arith.constant -4.000000e+01 : f32
    %750 = vector.broadcast %cst_260 : f32 to vector<1x128xf32>
    %751 = arith.cmpf oge, %749, %750 : vector<1x128xf32>
    %cst_261 = arith.constant -7.000000e+01 : f32
    %752 = vector.broadcast %cst_261 : f32 to vector<1x128xf32>
    %753 = arith.select %751, %752, %749 : vector<1x128xi1>, vector<1x128xf32>
    %cst_262 = arith.constant -7.000000e+01 : f32
    %754 = vector.broadcast %cst_262 : f32 to vector<1x128xf32>
    %755 = arith.subf %753, %754 : vector<1x128xf32>
    %cst_263 = arith.constant 0.0333333351 : f32
    %756 = vector.broadcast %cst_263 : f32 to vector<1x128xf32>
    %757 = arith.mulf %755, %756 : vector<1x128xf32>
    %758 = arith.index_cast %722 : i32 to index
    %c0_264 = arith.constant 0 : index
    %c0_265 = arith.constant 0 : index
    %759 = vector.load %arg5[%758, %c0_264, %c0_265] : memref<16x1x128xf32, #tpu.memory_space<vmem>>, vector<1x1x128xf32>
    %760 = vector.shape_cast %759 : vector<1x1x128xf32> to vector<1x128xf32>
    %761 = vector.shape_cast %757 : vector<1x128xf32> to vector<1x1x128xf32>
    tpu.vector_store %arg5[%758, %c0_264, %c0_265], %761 {strides = array<i32>} : memref<16x1x128xf32, #tpu.memory_space<vmem>>, vector<1x1x128xf32>,
    %762 = arith.extui %751 : vector<1x128xi1> to vector<1x128xi32>
    %763 = arith.sitofp %762 : vector<1x128xi32> to vector<1x128xf32>
    %764 = arith.index_cast %722 : i32 to index
    %c0_266 = arith.constant 0 : index
    %c0_267 = arith.constant 0 : index
    %765 = vector.load %arg7[%764, %c0_266, %c0_267] : memref<16x1x128xf32, #tpu.memory_space<vmem>>, vector<1x1x128xf32>
    %766 = vector.shape_cast %765 : vector<1x1x128xf32> to vector<1x128xf32>
    %767 = vector.shape_cast %763 : vector<1x128xf32> to vector<1x1x128xf32>
    tpu.vector_store %arg7[%764, %c0_266, %c0_267], %767 {strides = array<i32>} : memref<16x1x128xf32, #tpu.memory_space<vmem>>, vector<1x1x128xf32>,
    %c1_i32_268 = arith.constant 1 : i32
    %c0_269 = arith.constant 0 : index
    %c0_270 = arith.constant 0 : index
    %768 = vector.load %arg8[%c0_269, %c0_270] : memref<1x128xf32, #tpu.memory_space<vmem>>, vector<1x128xf32>
    tpu.vector_store %arg8[%c0_269, %c0_270], %727 {strides = array<i32>} : memref<1x128xf32, #tpu.memory_space<vmem>>, vector<1x128xf32>,
    %c0_271 = arith.constant 0 : index
    %c0_272 = arith.constant 0 : index
    %769 = vector.load %arg9[%c0_271, %c0_272] : memref<1x128xf32, #tpu.memory_space<vmem>>, vector<1x128xf32>
    tpu.vector_store %arg9[%c0_271, %c0_272], %740 {strides = array<i32>} : memref<1x128xf32, #tpu.memory_space<vmem>>, vector<1x128xf32>,
    %c0_273 = arith.constant 0 : index
    %c0_274 = arith.constant 0 : index
    %770 = vector.load %arg10[%c0_273, %c0_274] : memref<1x128xf32, #tpu.memory_space<vmem>>, vector<1x128xf32>
    tpu.vector_store %arg10[%c0_273, %c0_274], %753 {strides = array<i32>} : memref<1x128xf32, #tpu.memory_space<vmem>>, vector<1x128xf32>,
    return
  }
  func.func @transform_0(%arg0: i32, %arg1: i32) -> i32 {
    %c0_i32 = arith.constant 0 : i32
    %c0_i32_0 = arith.constant 0 : i32
    return %c0_i32 : i32
  }
  func.func @transform_1(%arg0: i32, %arg1: i32) -> (i32, i32, i32) {
    %c0_i32 = arith.constant 0 : i32
    %c0_i32_0 = arith.constant 0 : i32
    return %arg1, %arg0, %c0_i32 : i32, i32, i32
  }
  func.func @transform_2(%arg0: i32, %arg1: i32) -> (i32, i32, i32) {
    %c0_i32 = arith.constant 0 : i32
    %c0_i32_0 = arith.constant 0 : i32
    return %arg1, %arg0, %c0_i32 : i32, i32, i32
  }
  func.func @transform_3(%arg0: i32, %arg1: i32) -> (i32, i32, i32) {
    %c0_i32 = arith.constant 0 : i32
    %c0_i32_0 = arith.constant 0 : i32
    return %arg1, %arg0, %c0_i32 : i32, i32, i32
  }
  func.func @transform_4(%arg0: i32, %arg1: i32) -> (i32, i32, i32) {
    %c0_i32 = arith.constant 0 : i32
    %c0_i32_0 = arith.constant 0 : i32
    return %arg1, %arg0, %c0_i32 : i32, i32, i32
  }
  func.func @transform_5(%arg0: i32, %arg1: i32) -> (i32, i32, i32) {
    %c0_i32 = arith.constant 0 : i32
    %c0_i32_0 = arith.constant 0 : i32
    return %arg1, %arg0, %c0_i32 : i32, i32, i32
  }
}

</mosaic_0001>

<bundles_post_ra>
// kernel: tpu_custom_call.1
= control target key start
LH: loop header
LB: loop body
LE: loop exit
PB: predicated region body
PF: predicated region fallthrough
CT: control target
= control target key end

     0   :  { %11 = vsyncpa [#allocation8], 0  ;;  %s1238_s0 = inlined_call_operand.hbm [shape: f32[2], index: 0, kind: input, shape index: {}]   ;;  %s1239_s1 = inlined_call_operand.hbm [shape: f32[16,1,128], index: 1, kind: input, shape index: {}]   ;;  %s1240_s2 = inlined_call_operand.hbm [shape: f32[16,1,128], index: 2, kind: output, shape index: {0}]   ;;  %s1241_s3 = inlined_call_operand.hbm [shape: f32[16,1,128], index: 3, kind: output, shape index: {1}]   ;;  %s1242_s4 = inlined_call_operand.hbm [shape: f32[16,1,128], index: 4, kind: output, shape index: {2}]   ;;  %s1243_s5 = inlined_call_operand.hbm [shape: f32[16,1,128], index: 5, kind: output, shape index: {3}]  }
   0x1   :  { %12 = vsyncpa [#allocation6], 0 }
   0x2   :  { %13 = vsyncpa [#allocation7], 0 }
   0x3   :  { %14 = vsyncpa [#allocation12], 0 }
   0x4   :  { %15 = vsyncpa [#allocation15], 0  ;;  %s763_s20 = scalar_lea.hbm %s1238_s0, 16 }
   0x5   :  { %p764_p0 = scmp.ne.s32.totalorder %s1238_s0, %s763_s20  ;;  %p767_p1 = scmp.lt.u32.totalorder %s763_s20, %s1238_s0 }
   0x7   :  { %p769_p2 = pnand %p767_p1, %p764_p0 }
   0x9   :  { %772 = shalt.err (!%p769_p2)
}
   0xa   :  { %s893_s25 = smov [#allocation5]   ;;  %s894_s28 = smov [#allocation9]  }
   0xb   :  { %23 = dma.hbm_to_smem %s1238_s0, 16, %s893_s25, [#allocation8]  }
   0xc   :  { %s29_s29 = sshll.u32 %s894_s28, 4  ;;  %s773_s7 = scalar_lea.hbm %s1239_s1, 256  ;;  %s30_s29 = int_to_ptr.vmem [resolvable:$true] %s29_s29 }
   0xd   :  { %p774_p3 = scmp.ne.s32.totalorder %s1239_s1, %s773_s7  ;;  %p777_p4 = scmp.lt.u32.totalorder %s773_s7, %s1239_s1 }
   0xf   :  { %p779_p5 = pnand %p777_p4, %p774_p3 }
  0x11   :  { %782 = shalt.err (!%p779_p5)
}
  0x12   :  { %s783_s12 = scalar_lea.vmem %s30_s29, 256  ;;  %p788_p7 = scmp.lt.s32.totalorder %s30_s29, %s30_s29 }
  0x13   :  { %p784_p6 = scmp.ne.s32.totalorder %s30_s29, %s783_s12  ;;  %p789_p8 = scmp.lt.s32.totalorder %s783_s12, %s783_s12 }
  0x15   :  { %p790_p9 = por %p789_p8, %p788_p7 }
  0x17   :  { %p791_p10 = pnand %p790_p9, %p784_p6 }
  0x19   :  { %794 = shalt.err (!%p791_p10)
}
  0x1a   :  { %s895_s0 = smov 16   ;;  %s896_s13 = smov 1  }
  0x1b   :  { %35 = dma.hbm_to_vmem [thread:$0]  %s1239_s1, 256, %s30_s29, [#allocation6], %s895_s0, %s895_s0, %s896_s13  }
  0x1c   :  { %883 = dma.done.wait [#allocation8], 16  }
  0x1d   :  { %884 = vsyncadd [#allocation8], 4294967280 }
  0x1e   :  { %885 = dma.done.wait [#allocation6], 256  }
  0x1f   :  { %886 = vsyncadd [#allocation6], 4294967040 }
  0x20   :  { %42 = sfence }
  0x21   :  { %s43_s16 = sld [smem:[#allocation5]]  ;;  %v897_v0 = vmov 0.0   ;;  %s672_s17 = sld [smem:[#allocation5 + $0x1]]  ;;  %v962_v1 = vld [vmem:[#allocation9] sm:$0x1]  ;;  %v898_v57 = vmov -70.0  }
  0x22   :  { %50 = vst [vmem:[#allocation2] sm:$0x1] %v897_v0  ;;  %51 = vst [vmem:[#allocation3] sm:$0x1] %v897_v0  ;;  %v968_v6 = vld [vmem:[#allocation9 + $0x1] sm:$0x1] }
  0x23   :  { %v974_v12 = vld [vmem:[#allocation9 + $0x2] sm:$0x1]  ;;  %v981_v19 = vld [vmem:[#allocation9 + $0x3] sm:$0x1]  ;;  %v985_v24 = vld [vmem:[#allocation9 + $0x4] sm:$0x1] }
  0x24   :  { %v991_v28 = vld [vmem:[#allocation9 + $0x5] sm:$0x1]  ;;  %v998_v33 = vld [vmem:[#allocation9 + $0x6] sm:$0x1]  ;;  %v1005_v39 = vld [vmem:[#allocation9 + $0x7] sm:$0x1] }
  0x25   :  { %v1015_v46 = vld [vmem:[#allocation9 + $0x8] sm:$0x1]  ;;  %v1022_v50 = vld [vmem:[#allocation9 + $0x9] sm:$0x1]  ;;  %v1029_v54 = vld [vmem:[#allocation9 + $0xa] sm:$0x1] }
  0x26   :  { %52 = vst [vmem:[#allocation4] sm:$0x1] %v898_v57  ;;  %v1036_v61 = vld [vmem:[#allocation9 + $0xb] sm:$0x1]  ;;  %s899_s1 = smov [#allocation11]  }
  0x27   :  { %v964_v2 = vstv %s43_s16  ;;  %v972_v11 = vstv %s672_s17  ;;  %s568_s18 = sshll.u32 %s899_s1, 4  ;;  %s569_s18 = int_to_ptr.vmem [resolvable:$true] %s568_s18 }
  0x28   :  { %v65_v3 = vmul.f32 %v964_v2, %v962_v1  ;;  %v66_v10 = vmul.f32 %v964_v2, %v968_v6  ;;  %v67_v17 = vmul.f32 %v964_v2, %v974_v12  ;;  %v68_v23 = vmul.f32 %v964_v2, %v981_v19  ;;  %s795_s19 = scalar_lea.vmem %s569_s18, 256  ;;  %p800_p12 = scmp.lt.s32.totalorder %s569_s18, %s569_s18 }
  0x29   :  { %v53_v4 = vld [vmem:[#allocation2] sm:$0x1]  ;;  %v54_v5 = vld [vmem:[#allocation3] sm:$0x1]  ;;  %v69_v26 = vmul.f32 %v964_v2, %v985_v24  ;;  %v70_v30 = vmul.f32 %v964_v2, %v991_v28  ;;  %v71_v37 = vmul.f32 %v964_v2, %v998_v33  ;;  %v72_v44 = vmul.f32 %v964_v2, %v1005_v39  ;;  %p796_p11 = scmp.ne.s32.totalorder %s569_s18, %s795_s19  ;;  %p801_p13 = scmp.lt.s32.totalorder %s795_s19, %s795_s19 }
  0x2a   :  { %v89_v7 = vmul.f32 0.1, %v53_v4  ;;  %v91_v8 = vmul.f32 0.1, %v54_v5  ;;  %v309_v49 = vmul.f32 %v1015_v46, %v964_v2  ;;  %v310_v53 = vmul.f32 %v1022_v50, %v964_v2 }
  0x2b   :  { %v311_v59 = vmul.f32 %v1029_v54, %v964_v2  ;;  %v312_v4 = vmul.f32 %v1036_v61, %v964_v2  ;;  %p802_p0 = por %p801_p13, %p800_p12 }
  0x2c   :  { %v90_v9 = vadd.f32 %v89_v7, %v65_v3 }
  0x2d   :  { %p803_p1 = pnand %p802_p0, %p796_p11 }
  0x2e   :  { %v92_v13 = vadd.f32 %v91_v8, %v90_v9  ;;  %v112_v14 = vmul.f32 0.1, %v90_v9  ;;  %v1046_v8 = vld [vmem:[#allocation9 + $0xc] sm:$0x1]  ;;  %v73_v9 = vmul.f32 0.1, %v962_v1 }
  0x2f   :  { %v74_v1 = vmul.f32 0.1, %v968_v6 }
  0x30   :  { %vm93_vm0 = vcmp.gt.f32.partialorder %v92_v13, %v972_v11  ;;  %v97_v15 = vsub.f32 %v92_v13, %v972_v11  ;;  %v113_v16 = vadd.f32 %v112_v14, %v66_v10  ;;  %v55_v14 = vld [vmem:[#allocation4] sm:$0x1] }
  0x31   :  { %v673_v18 = vsel %vm93_vm0, 1.0, %v897_v0 }
  0x32   :  { %96 = vst [vmem:[#allocation13] sm:$0x1] %v673_v18  ;;  %v98_v20 = vsel %vm93_vm0, %v97_v15, %v92_v13  ;;  %v139_v21 = vmul.f32 0.1, %v113_v16  ;;  %v81_v15 = vadd.f32 -0.7, %v73_v9 }
  0x33   :  { %731 = vtanh.f32 %v98_v20  ;;  %v1054_v20 = vld [vmem:[#allocation9 + $0xd] sm:$0x1] }
  0x34   :  { %v140_v22 = vadd.f32 %v139_v21, %v67_v17  ;;  %v313_v17 = vmul.f32 %v1046_v8, %v964_v2 }
  0x36   :  { %v166_v25 = vmul.f32 0.1, %v140_v22 }
  0x38   :  { %v989_v27 = vadd.f32 %v166_v25, %v68_v23  ;;  %v314_v23 = vmul.f32 %v1054_v20, %v964_v2 }
  0x3a   :  { %v193_v29 = vmul.f32 0.1, %v989_v27 }
  0x3c   :  { %v996_v31 = vadd.f32 %v193_v29, %v69_v26  ;;  %v1063_v29 = vld [vmem:[#allocation9 + $0xe] sm:$0x1] }
  0x3d   :  { %v732_v32 = vpop.eup %731 }
  0x3e   :  { %100 = vst [vmem:[#allocation10] sm:$0x1] %v732_v32  ;;  %v114_v34 = vmul.f32 0.1, %v732_v32  ;;  %v220_v35 = vmul.f32 0.1, %v996_v31 }
  0x3f   :  { %v82_v32 = vadd.f32 -0.7, %v74_v1 }
  0x40   :  { %v115_v36 = vadd.f32 %v114_v34, %v113_v16  ;;  %v1003_v38 = vadd.f32 %v220_v35, %v70_v30  ;;  %v101_v16 = vmul.f32 0.99, %v55_v14 }
  0x42   :  { %vm116_vm1 = vcmp.gt.f32.partialorder %v115_v36, %v972_v11  ;;  %v121_v40 = vsub.f32 %v115_v36, %v972_v11  ;;  %v247_v41 = vmul.f32 0.1, %v1003_v38  ;;  %v102_v21 = vadd.f32 %v101_v16, %v81_v15 }
  0x43   :  { %v676_v42 = vsel %vm116_vm1, 1.0, %v897_v0 }
  0x44   :  { %120 = vst [vmem:[#allocation13 + $0x1] sm:$0x1] %v676_v42  ;;  %v122_v43 = vsel %vm116_vm1, %v121_v40, %v115_v36  ;;  %v1013_v45 = vadd.f32 %v247_v41, %v71_v37  ;;  %vm103_vm3 = vcmp.ge.f32.partialorder %v102_v21, -40.0  ;;  %v315_v36 = vmul.f32 %v1063_v29, %v964_v2  ;;  %v1070_v40 = vld [vmem:[#allocation9 + $0xf] sm:$0x1] }
  0x45   :  { %733 = vtanh.f32 %v122_v43  ;;  %v104_v26 = vsel %vm103_vm3, -70.0, %v102_v21  ;;  %v75_v41 = vmul.f32 0.1, %v974_v12 }
  0x46   :  { %v274_v47 = vmul.f32 0.1, %v1013_v45  ;;  %v126_v30 = vmul.f32 0.99, %v104_v26  ;;  %v674_v9 = vadd.f32 70.0, %v104_v26 }
  0x48   :  { %v1018_v48 = vadd.f32 %v274_v47, %v72_v44  ;;  %v127_v35 = vadd.f32 %v126_v30, %v82_v32 }
  0x4a   :  { %v333_v51 = vmul.f32 0.1, %v1018_v48  ;;  %vm128_vm4 = vcmp.ge.f32.partialorder %v127_v35, -40.0 }
  0x4b   :  { %v129_v44 = vsel %vm128_vm4, -70.0, %v127_v35  ;;  %v678_v16 = vsel %vm128_vm4, 1.0, %v897_v0 }
  0x4c   :  { %v1025_v52 = vadd.f32 %v333_v51, %v309_v49  ;;  %v153_v47 = vmul.f32 0.99, %v129_v44  ;;  %v83_v49 = vadd.f32 -0.7, %v75_v41  ;;  %137 = vst [vmem:[#allocation14 + $0x1] sm:$0x1] %v678_v16 }
  0x4e   :  { %v360_v55 = vmul.f32 0.1, %v1025_v52 }
  0x4f   :  { %v734_v56 = vpop.eup %733 }
  0x50   :  { %125 = vst [vmem:[#allocation10 + $0x1] sm:$0x1] %v734_v56  ;;  %v141_v58 = vmul.f32 0.1, %v734_v56  ;;  %v1034_v60 = vadd.f32 %v360_v55, %v310_v53  ;;  %v316_v53 = vmul.f32 %v1070_v40, %v964_v2  ;;  %v154_v56 = vadd.f32 %v153_v47, %v83_v49 }
  0x52   :  { %v142_v62 = vadd.f32 %v141_v58, %v140_v22  ;;  %v387_v63 = vmul.f32 0.1, %v1034_v60  ;;  %vm155_vm6 = vcmp.ge.f32.partialorder %v154_v56, -40.0 }
  0x53   :  { %v156_v2 = vsel %vm155_vm6, -70.0, %v154_v56  ;;  %v681_v21 = vsel %vm155_vm6, 1.0, %v897_v0 }
  0x54   :  { %vm143_vm2 = vcmp.gt.f32.partialorder %v142_v62, %v972_v11  ;;  %v148_v3 = vsub.f32 %v142_v62, %v972_v11  ;;  %v1043_v5 = vadd.f32 %v387_v63, %v311_v59  ;;  %v76_v59 = vmul.f32 0.1, %v981_v19  ;;  %164 = vst [vmem:[#allocation14 + $0x2] sm:$0x1] %v681_v21 }
  0x55   :  { %v679_v7 = vsel %vm143_vm2, 1.0, %v897_v0  ;;  %v180_v63 = vmul.f32 0.99, %v156_v2  ;;  %v77_v19 = vmul.f32 0.1, %v985_v24 }
  0x56   :  { %147 = vst [vmem:[#allocation13 + $0x2] sm:$0x1] %v679_v7  ;;  %v149_v10 = vsel %vm143_vm2, %v148_v3, %v142_v62  ;;  %v414_v13 = vmul.f32 0.1, %v1043_v5  ;;  %v84_v3 = vadd.f32 -0.7, %v76_v59 }
  0x57   :  { %735 = vtanh.f32 %v149_v10  ;;  %v675_v7 = vsel %vm103_vm3, 1.0, %v897_v0  ;;  %v106_v10 = vmul.f32 0.033333335, %v674_v9  ;;  %v85_v15 = vadd.f32 -0.7, %v77_v19 }
  0x58   :  { %v1052_v18 = vadd.f32 %v414_v13, %v312_v4  ;;  %v181_v4 = vadd.f32 %v180_v63, %v84_v3  ;;  %110 = vst [vmem:[#allocation14] sm:$0x1] %v675_v7  ;;  %v78_v24 = vmul.f32 0.1, %v991_v28  ;;  %v79_v28 = vmul.f32 0.1, %v998_v33 }
  0x59   :  { %107 = vst [vmem:[#allocation11] sm:$0x1] %v106_v10 }
  0x5a   :  { %v441_v22 = vmul.f32 0.1, %v1052_v18  ;;  %vm182_vm7 = vcmp.ge.f32.partialorder %v181_v4, -40.0 }
  0x5b   :  { %v183_v13 = vsel %vm182_vm7, -70.0, %v181_v4 }
  0x5c   :  { %v1060_v25 = vadd.f32 %v441_v22, %v313_v17  ;;  %v207_v14 = vmul.f32 0.99, %v183_v13  ;;  %v677_v17 = vadd.f32 70.0, %v129_v44  ;;  %v683_v49 = vadd.f32 70.0, %v183_v13 }
  0x5e   :  { %v468_v34 = vmul.f32 0.1, %v1060_v25  ;;  %v208_v22 = vadd.f32 %v207_v14, %v85_v15  ;;  %v185_v56 = vmul.f32 0.033333335, %v683_v49 }
  0x60   :  { %v1068_v37 = vadd.f32 %v468_v34, %v314_v23  ;;  %v131_v23 = vmul.f32 0.033333335, %v677_v17  ;;  %vm209_vm8 = vcmp.ge.f32.partialorder %v208_v22, -40.0  ;;  %v86_v34 = vadd.f32 -0.7, %v78_v24 }
  0x61   :  { %v736_v6 = vpop.eup %735  ;;  %v210_v30 = vsel %vm209_vm8, -70.0, %v208_v22  ;;  %187 = vst [vmem:[#allocation11 + $0x3] sm:$0x1] %v185_v56  ;;  %v687_v33 = vsel %vm209_vm8, 1.0, %v897_v0 }
  0x62   :  { %152 = vst [vmem:[#allocation10 + $0x2] sm:$0x1] %v736_v6  ;;  %v168_v42 = vmul.f32 0.1, %v736_v6  ;;  %v495_v43 = vmul.f32 0.1, %v1068_v37 }
  0x63   :  { %133 = vst [vmem:[#allocation11 + $0x1] sm:$0x1] %v131_v23  ;;  %v234_v32 = vmul.f32 0.99, %v210_v30  ;;  %218 = vst [vmem:[#allocation14 + $0x4] sm:$0x1] %v687_v33 }
  0x64   :  { %v169_v51 = vadd.f32 %v168_v42, %v989_v27  ;;  %v1078_v55 = vadd.f32 %v495_v43, %v315_v36  ;;  %v680_v36 = vadd.f32 70.0, %v156_v2  ;;  %v318_v23 = vmul.f32 0.1, %v1022_v50 }
  0x65   :  { %v235_v6 = vadd.f32 %v234_v32, %v86_v34 }
  0x66   :  { %vm170_vm5 = vcmp.gt.f32.partialorder %v169_v51, %v972_v11  ;;  %v175_v12 = vsub.f32 %v169_v51, %v972_v11  ;;  %v522_v57 = vmul.f32 0.1, %v1078_v55  ;;  %v158_v42 = vmul.f32 0.033333335, %v680_v36 }
  0x67   :  { %v682_v58 = vsel %vm170_vm5, 1.0, %v897_v0  ;;  %vm236_vm10 = vcmp.ge.f32.partialorder %v235_v6, -40.0 }
  0x68   :  { %174 = vst [vmem:[#allocation13 + $0x3] sm:$0x1] %v682_v58  ;;  %v176_v62 = vsel %vm170_vm5, %v175_v12, %v169_v51  ;;  %v1085_v27 = vadd.f32 %v522_v57, %v316_v53  ;;  %160 = vst [vmem:[#allocation11 + $0x2] sm:$0x1] %v158_v42  ;;  %v237_v47 = vsel %vm236_vm10, -70.0, %v235_v6  ;;  %v686_v58 = vadd.f32 70.0, %v210_v30 }
  0x69   :  { %737 = vtanh.f32 %v176_v62  ;;  %v261_v51 = vmul.f32 0.99, %v237_v47  ;;  %v87_v53 = vadd.f32 -0.7, %v79_v28  ;;  %v80_v57 = vmul.f32 0.1, %v1005_v39 }
  0x6a   :  { %548 = vst [vmem:[#allocation2] sm:$0x1] %v1085_v27  ;;  %v212_v2 = vmul.f32 0.033333335, %v686_v58  ;;  %v690_v3 = vsel %vm236_vm10, 1.0, %v897_v0  ;;  %v689_v4 = vadd.f32 70.0, %v237_v47 }
  0x6b   :  { %v262_v12 = vadd.f32 %v261_v51, %v87_v53  ;;  %v88_v62 = vadd.f32 -0.7, %v80_v57  ;;  %245 = vst [vmem:[#allocation14 + $0x5] sm:$0x1] %v690_v3  ;;  %v317_v39 = vmul.f32 0.1, %v1015_v46 }
  0x6c   :  { %214 = vst [vmem:[#allocation11 + $0x4] sm:$0x1] %v212_v2  ;;  %v239_v10 = vmul.f32 0.033333335, %v689_v4  ;;  %v320_v53 = vmul.f32 0.1, %v1036_v61 }
  0x6d   :  { %vm263_vm11 = vcmp.ge.f32.partialorder %v262_v12, -40.0  ;;  %v325_v14 = vadd.f32 -0.7, %v317_v39  ;;  %v321_v61 = vmul.f32 0.1, %v1046_v8 }
  0x6e   :  { %v264_v59 = vsel %vm263_vm11, -70.0, %v262_v12  ;;  %241 = vst [vmem:[#allocation11 + $0x5] sm:$0x1] %v239_v10  ;;  %v693_v22 = vsel %vm263_vm11, 1.0, %v897_v0  ;;  %v328_v12 = vadd.f32 -0.7, %v320_v53 }
  0x6f   :  { %v288_v63 = vmul.f32 0.99, %v264_v59  ;;  %v692_v21 = vadd.f32 70.0, %v264_v59  ;;  %272 = vst [vmem:[#allocation14 + $0x6] sm:$0x1] %v693_v22 }
  0x71   :  { %v289_v7 = vadd.f32 %v288_v63, %v88_v62 }
  0x73   :  { %v738_v1 = vpop.eup %737  ;;  %vm290_vm12 = vcmp.ge.f32.partialorder %v289_v7, -40.0 }
  0x74   :  { %179 = vst [vmem:[#allocation10 + $0x3] sm:$0x1] %v738_v1  ;;  %v195_v26 = vmul.f32 0.1, %v738_v1  ;;  %v291_v13 = vsel %vm290_vm12, -70.0, %v289_v7  ;;  %v696_v32 = vsel %vm290_vm12, 1.0, %v897_v0 }
  0x75   :  { %v347_v16 = vmul.f32 0.99, %v291_v13  ;;  %v695_v34 = vadd.f32 70.0, %v291_v13  ;;  %299 = vst [vmem:[#allocation14 + $0x7] sm:$0x1] %v696_v32 }
  0x76   :  { %v196_v35 = vadd.f32 %v195_v26, %v996_v31  ;;  %v684_v31 = vsel %vm182_vm7, 1.0, %v897_v0  ;;  %v266_v26 = vmul.f32 0.033333335, %v692_v21 }
  0x77   :  { %191 = vst [vmem:[#allocation14 + $0x3] sm:$0x1] %v684_v31  ;;  %v348_v1 = vadd.f32 %v347_v16, %v325_v14  ;;  %v293_v36 = vmul.f32 0.033333335, %v695_v34 }
  0x78   :  { %vm197_vm9 = vcmp.gt.f32.partialorder %v196_v35, %v972_v11  ;;  %v202_v41 = vsub.f32 %v196_v35, %v972_v11  ;;  %268 = vst [vmem:[#allocation11 + $0x6] sm:$0x1] %v266_v26 }
  0x79   :  { %v685_v43 = vsel %vm197_vm9, 1.0, %v897_v0  ;;  %vm349_vm14 = vcmp.ge.f32.partialorder %v348_v1, -40.0  ;;  %295 = vst [vmem:[#allocation11 + $0x7] sm:$0x1] %v293_v36 }
  0x7a   :  { %201 = vst [vmem:[#allocation13 + $0x4] sm:$0x1] %v685_v43  ;;  %v203_v44 = vsel %vm197_vm9, %v202_v41, %v196_v35  ;;  %v350_v30 = vsel %vm349_vm14, -70.0, %v348_v1  ;;  %v319_v41 = vmul.f32 0.1, %v1029_v54  ;;  %v699_v42 = vsel %vm349_vm14, 1.0, %v897_v0 }
  0x7b   :  { %739 = vtanh.f32 %v203_v44  ;;  %v374_v35 = vmul.f32 0.99, %v350_v30  ;;  %v698_v43 = vadd.f32 70.0, %v350_v30  ;;  %358 = vst [vmem:[#allocation14 + $0x8] sm:$0x1] %v699_v42 }
  0x7c   :  { %v327_v50 = vadd.f32 -0.7, %v319_v41  ;;  %v324_v42 = vmul.f32 0.1, %v1070_v40 }
  0x7d   :  { %v352_v47 = vmul.f32 0.033333335, %v698_v43 }
  0x7f   :  { %354 = vst [vmem:[#allocation11 + $0x8] sm:$0x1] %v352_v47 }
  0x85   :  { %v740_v9 = vpop.eup %739 }
  0x86   :  { %206 = vst [vmem:[#allocation10 + $0x4] sm:$0x1] %v740_v9  ;;  %v222_v19 = vmul.f32 0.1, %v740_v9 }
  0x88   :  { %v223_v15 = vadd.f32 %v222_v19, %v1003_v38  ;;  %v326_v38 = vadd.f32 -0.7, %v318_v23 }
  0x8a   :  { %vm224_vm13 = vcmp.gt.f32.partialorder %v223_v15, %v972_v11  ;;  %v229_v17 = vsub.f32 %v223_v15, %v972_v11  ;;  %v375_v6 = vadd.f32 %v374_v35, %v326_v38 }
  0x8b   :  { %v688_v46 = vsel %vm224_vm13, 1.0, %v897_v0 }
  0x8c   :  { %228 = vst [vmem:[#allocation13 + $0x5] sm:$0x1] %v688_v46  ;;  %v230_v24 = vsel %vm224_vm13, %v229_v17, %v223_v15  ;;  %vm376_vm15 = vcmp.ge.f32.partialorder %v375_v6, -40.0  ;;  %v322_v15 = vmul.f32 0.1, %v1054_v20 }
  0x8d   :  { %741 = vtanh.f32 %v230_v24  ;;  %v377_v28 = vsel %vm376_vm15, -70.0, %v375_v6  ;;  %v702_v31 = vsel %vm376_vm15, 1.0, %v897_v0  ;;  %v323_v24 = vmul.f32 0.1, %v1063_v29 }
  0x8e   :  { %v401_v44 = vmul.f32 0.99, %v377_v28  ;;  %385 = vst [vmem:[#allocation14 + $0x9] sm:$0x1] %v702_v31  ;;  %v701_v54 = vadd.f32 70.0, %v377_v28 }
  0x8f   :  { %v330_v16 = vadd.f32 -0.7, %v322_v15  ;;  %v331_v20 = vadd.f32 -0.7, %v323_v24 }
  0x90   :  { %v402_v51 = vadd.f32 %v401_v44, %v327_v50  ;;  %v379_v58 = vmul.f32 0.033333335, %v701_v54 }
  0x92   :  { %vm403_vm0 = vcmp.ge.f32.partialorder %v402_v51, -40.0  ;;  %381 = vst [vmem:[#allocation11 + $0x9] sm:$0x1] %v379_v58 }
  0x93   :  { %v404_v33 = vsel %vm403_vm0, -70.0, %v402_v51  ;;  %v705_v4 = vsel %vm403_vm0, 1.0, %v897_v0 }
  0x94   :  { %v428_v59 = vmul.f32 0.99, %v404_v33  ;;  %v704_v7 = vadd.f32 70.0, %v404_v33  ;;  %412 = vst [vmem:[#allocation14 + $0xa] sm:$0x1] %v705_v4 }
  0x96   :  { %v429_v63 = vadd.f32 %v428_v59, %v328_v12  ;;  %v406_v9 = vmul.f32 0.033333335, %v704_v7 }
  0x97   :  { %v742_v49 = vpop.eup %741 }
  0x98   :  { %233 = vst [vmem:[#allocation10 + $0x5] sm:$0x1] %v742_v49  ;;  %v249_v56 = vmul.f32 0.1, %v742_v49  ;;  %vm430_vm2 = vcmp.ge.f32.partialorder %v429_v63, -40.0 }
  0x99   :  { %v431_v39 = vsel %vm430_vm2, -70.0, %v429_v63  ;;  %408 = vst [vmem:[#allocation11 + $0xa] sm:$0x1] %v406_v9  ;;  %v708_v10 = vsel %vm430_vm2, 1.0, %v897_v0 }
  0x9a   :  { %v250_v57 = vadd.f32 %v249_v56, %v1013_v45  ;;  %v329_v45 = vadd.f32 -0.7, %v321_v61  ;;  %v455_v19 = vmul.f32 0.99, %v431_v39  ;;  %v707_v13 = vadd.f32 70.0, %v431_v39 }
  0x9b   :  { %439 = vst [vmem:[#allocation14 + $0xb] sm:$0x1] %v708_v10 }
  0x9c   :  { %vm251_vm1 = vcmp.gt.f32.partialorder %v250_v57, %v972_v11  ;;  %v256_v62 = vsub.f32 %v250_v57, %v972_v11  ;;  %v456_v14 = vadd.f32 %v455_v19, %v329_v45  ;;  %v433_v8 = vmul.f32 0.033333335, %v707_v13 }
  0x9d   :  { %v691_v2 = vsel %vm251_vm1, 1.0, %v897_v0 }
  0x9e   :  { %255 = vst [vmem:[#allocation13 + $0x6] sm:$0x1] %v691_v2  ;;  %v257_v3 = vsel %vm251_vm1, %v256_v62, %v250_v57  ;;  %vm457_vm3 = vcmp.ge.f32.partialorder %v456_v14, -40.0  ;;  %435 = vst [vmem:[#allocation11 + $0xb] sm:$0x1] %v433_v8 }
  0x9f   :  { %743 = vtanh.f32 %v257_v3  ;;  %v458_v17 = vsel %vm457_vm3, -70.0, %v456_v14  ;;  %v711_v21 = vsel %vm457_vm3, 1.0, %v897_v0 }
  0xa0   :  { %v482_v22 = vmul.f32 0.99, %v458_v17  ;;  %v710_v46 = vadd.f32 70.0, %v458_v17  ;;  %466 = vst [vmem:[#allocation14 + $0xc] sm:$0x1] %v711_v21 }
  0xa2   :  { %v483_v23 = vadd.f32 %v482_v22, %v330_v16  ;;  %v460_v38 = vmul.f32 0.033333335, %v710_v46 }
  0xa4   :  { %vm484_vm4 = vcmp.ge.f32.partialorder %v483_v23, -40.0  ;;  %462 = vst [vmem:[#allocation11 + $0xc] sm:$0x1] %v460_v38 }
  0xa5   :  { %v714_v32 = vsel %vm484_vm4, 1.0, %v897_v0  ;;  %v485_v34 = vsel %vm484_vm4, -70.0, %v483_v23 }
  0xa6   :  { %493 = vst [vmem:[#allocation14 + $0xd] sm:$0x1] %v714_v32  ;;  %v713_v35 = vadd.f32 70.0, %v485_v34  ;;  %v509_v36 = vmul.f32 0.99, %v485_v34 }
  0xa8   :  { %v487_v41 = vmul.f32 0.033333335, %v713_v35  ;;  %v510_v50 = vadd.f32 %v509_v36, %v331_v20 }
  0xa9   :  { %v744_v1 = vpop.eup %743 }
  0xaa   :  { %260 = vst [vmem:[#allocation10 + $0x6] sm:$0x1] %v744_v1  ;;  %v276_v26 = vmul.f32 0.1, %v744_v1  ;;  %489 = vst [vmem:[#allocation11 + $0xd] sm:$0x1] %v487_v41 }
  0xab   :  { %vm511_vm6 = vcmp.ge.f32.partialorder %v510_v50, -40.0 }
  0xac   :  { %v277_v30 = vadd.f32 %v276_v26, %v1018_v48  ;;  %v332_v48 = vadd.f32 -0.7, %v324_v42  ;;  %v717_v28 = vsel %vm511_vm6, 1.0, %v897_v0  ;;  %v512_v44 = vsel %vm511_vm6, -70.0, %v510_v50 }
  0xad   :  { %520 = vst [vmem:[#allocation14 + $0xe] sm:$0x1] %v717_v28  ;;  %v716_v47 = vadd.f32 70.0, %v512_v44  ;;  %v536_v31 = vmul.f32 0.99, %v512_v44 }
  0xae   :  { %vm278_vm5 = vcmp.gt.f32.partialorder %v277_v30, %v972_v11  ;;  %v283_v6 = vsub.f32 %v277_v30, %v972_v11 }
  0xaf   :  { %v694_v29 = vsel %vm278_vm5, 1.0, %v897_v0  ;;  %v514_v49 = vmul.f32 0.033333335, %v716_v47  ;;  %v537_v51 = vadd.f32 %v536_v31, %v332_v48 }
  0xb0   :  { %282 = vst [vmem:[#allocation13 + $0x7] sm:$0x1] %v694_v29  ;;  %v284_v43 = vsel %vm278_vm5, %v283_v6, %v277_v30 }
  0xb1   :  { %745 = vtanh.f32 %v284_v43  ;;  %516 = vst [vmem:[#allocation11 + $0xe] sm:$0x1] %v514_v49  ;;  %vm538_vm7 = vcmp.ge.f32.partialorder %v537_v51, -40.0 }
  0xb2   :  { %v539_v53 = vsel %vm538_vm7, -70.0, %v537_v51  ;;  %v720_v56 = vsel %vm538_vm7, 1.0, %v897_v0 }
  0xb3   :  { %550 = vst [vmem:[#allocation4] sm:$0x1] %v539_v53  ;;  %547 = vst [vmem:[#allocation14 + $0xf] sm:$0x1] %v720_v56  ;;  %v719_v40 = vadd.f32 70.0, %v539_v53 }
  0xb5   :  { %v541_v12 = vmul.f32 0.033333335, %v719_v40 }
  0xb7   :  { %543 = vst [vmem:[#allocation11 + $0xf] sm:$0x1] %v541_v12 }
  0xbb   :  { %v746_v54 = vpop.eup %745 }
  0xbc   :  { %287 = vst [vmem:[#allocation10 + $0x7] sm:$0x1] %v746_v54  ;;  %v335_v57 = vmul.f32 0.1, %v746_v54 }
  0xbe   :  { %v336_v33 = vadd.f32 %v335_v57, %v1025_v52 }
  0xc0   :  { %vm337_vm8 = vcmp.gt.f32.partialorder %v336_v33, %v972_v11  ;;  %v342_v58 = vsub.f32 %v336_v33, %v972_v11 }
  0xc1   :  { %v697_v59 = vsel %vm337_vm8, 1.0, %v897_v0 }
  0xc2   :  { %341 = vst [vmem:[#allocation13 + $0x8] sm:$0x1] %v697_v59  ;;  %v343_v62 = vsel %vm337_vm8, %v342_v58, %v336_v33 }
  0xc3   :  { %747 = vtanh.f32 %v343_v62 }
  0xc4   :  { %806 = shalt.err (!%p803_p1)
}
  0xc5   :  { %s807_s22 = scalar_lea.hbm %s1241_s3, 256 }
  0xc6   :  { %p808_p2 = scmp.ne.s32.totalorder %s1241_s3, %s807_s22  ;;  %p811_p3 = scmp.lt.u32.totalorder %s807_s22, %s1241_s3 }
  0xc8   :  { %p813_p4 = pnand %p811_p3, %p808_p2 }
  0xca   :  { %816 = shalt.err (!%p813_p4)
}
  0xcb   :  { %574 = dma.vmem_to_hbm [thread:$0]  %s569_s18, 256, %s1241_s3, [#allocation12], %s895_s0, %s895_s0, %s896_s13  }
  0xcc   :  { %s900_s29 = smov [#allocation14]  }
  0xcd   :  { %v748_v52 = vpop.eup %747  ;;  %s592_s30 = sshll.u32 %s900_s29, 4  ;;  %s593_s30 = int_to_ptr.vmem [resolvable:$true] %s592_s30 }
  0xce   :  { %346 = vst [vmem:[#allocation10 + $0x8] sm:$0x1] %v748_v52  ;;  %v362_v2 = vmul.f32 0.1, %v748_v52  ;;  %s817_s6 = scalar_lea.vmem %s593_s30, 256  ;;  %p822_p6 = scmp.lt.s32.totalorder %s593_s30, %s593_s30 }
  0xcf   :  { %p818_p5 = scmp.ne.s32.totalorder %s593_s30, %s817_s6  ;;  %p823_p7 = scmp.lt.s32.totalorder %s817_s6, %s817_s6 }
  0xd0   :  { %v363_v63 = vadd.f32 %v362_v2, %v1034_v60 }
  0xd1   :  { %p824_p8 = por %p823_p7, %p822_p6 }
  0xd3   :  { %p825_p9 = pnand %p824_p8, %p818_p5 }
  0xd5   :  { %828 = shalt.err (!%p825_p9)
}
  0xd6   :  { %s829_s9 = scalar_lea.hbm %s1243_s5, 256 }
  0xd7   :  { %p830_p10 = scmp.ne.s32.totalorder %s1243_s5, %s829_s9  ;;  %p833_p11 = scmp.lt.u32.totalorder %s829_s9, %s1243_s5 }
  0xd9   :  { %p835_p12 = pnand %p833_p11, %p830_p10 }
  0xdb   :  { %838 = shalt.err (!%p835_p12)
}
  0xdc   :  { %598 = dma.vmem_to_hbm [thread:$0]  %s593_s30, 256, %s1243_s5, [#allocation15], %s895_s0, %s895_s0, %s896_s13   ;;  %vm364_vm9 = vcmp.gt.f32.partialorder %v363_v63, %v972_v11  ;;  %v369_v60 = vsub.f32 %v363_v63, %v972_v11 }
  0xdd   :  { %v700_v61 = vsel %vm364_vm9, 1.0, %v897_v0  ;;  %s901_s5 = smov [#allocation13]  }
  0xde   :  { %368 = vst [vmem:[#allocation13 + $0x9] sm:$0x1] %v700_v61  ;;  %v370_v3 = vsel %vm364_vm9, %v369_v60, %v363_v63  ;;  %s580_s16 = sshll.u32 %s901_s5, 4  ;;  %s581_s16 = int_to_ptr.vmem [resolvable:$true] %s580_s16 }
  0xdf   :  { %749 = vtanh.f32 %v370_v3  ;;  %s839_s17 = scalar_lea.vmem %s581_s16, 256  ;;  %p844_p0 = scmp.lt.s32.totalorder %s581_s16, %s581_s16 }
  0xe0   :  { %p840_p13 = scmp.ne.s32.totalorder %s581_s16, %s839_s17  ;;  %p845_p1 = scmp.lt.s32.totalorder %s839_s17, %s839_s17 }
  0xe2   :  { %p846_p2 = por %p845_p1, %p844_p0 }
  0xe4   :  { %p847_p3 = pnand %p846_p2, %p840_p13 }
  0xe9   :  { %v750_v4 = vpop.eup %749 }
  0xea   :  { %373 = vst [vmem:[#allocation10 + $0x9] sm:$0x1] %v750_v4  ;;  %v389_v7 = vmul.f32 0.1, %v750_v4 }
  0xec   :  { %v390_v45 = vadd.f32 %v389_v7, %v1043_v5 }
  0xee   :  { %vm391_vm10 = vcmp.gt.f32.partialorder %v390_v45, %v972_v11  ;;  %v396_v9 = vsub.f32 %v390_v45, %v972_v11 }
  0xef   :  { %v703_v39 = vsel %vm391_vm10, 1.0, %v897_v0 }
  0xf0   :  { %395 = vst [vmem:[#allocation13 + $0xa] sm:$0x1] %v703_v39  ;;  %v397_v19 = vsel %vm391_vm10, %v396_v9, %v390_v45 }
  0xf1   :  { %751 = vtanh.f32 %v397_v19 }
  0xfb   :  { %v752_v10 = vpop.eup %751 }
  0xfc   :  { %400 = vst [vmem:[#allocation10 + $0xa] sm:$0x1] %v752_v10  ;;  %v416_v13 = vmul.f32 0.1, %v752_v10 }
  0xfe   :  { %v417_v14 = vadd.f32 %v416_v13, %v1052_v18 }
 0x100   :  { %vm418_vm11 = vcmp.gt.f32.partialorder %v417_v14, %v972_v11  ;;  %v423_v15 = vsub.f32 %v417_v14, %v972_v11 }
 0x101   :  { %v706_v5 = vsel %vm418_vm11, 1.0, %v897_v0 }
 0x102   :  { %422 = vst [vmem:[#allocation13 + $0xb] sm:$0x1] %v706_v5  ;;  %v424_v8 = vsel %vm418_vm11, %v423_v15, %v417_v14 }
 0x103   :  { %753 = vtanh.f32 %v424_v8 }
 0x10d   :  { %v754_v16 = vpop.eup %753 }
 0x10e   :  { %427 = vst [vmem:[#allocation10 + $0xb] sm:$0x1] %v754_v16  ;;  %v443_v17 = vmul.f32 0.1, %v754_v16 }
 0x110   :  { %v444_v22 = vadd.f32 %v443_v17, %v1060_v25 }
 0x112   :  { %vm445_vm12 = vcmp.gt.f32.partialorder %v444_v22, %v972_v11  ;;  %v450_v21 = vsub.f32 %v444_v22, %v972_v11 }
 0x113   :  { %v709_v18 = vsel %vm445_vm12, 1.0, %v897_v0 }
 0x114   :  { %449 = vst [vmem:[#allocation13 + $0xc] sm:$0x1] %v709_v18  ;;  %v451_v46 = vsel %vm445_vm12, %v450_v21, %v444_v22 }
 0x115   :  { %755 = vtanh.f32 %v451_v46 }
 0x11f   :  { %v756_v1 = vpop.eup %755 }
 0x120   :  { %454 = vst [vmem:[#allocation10 + $0xc] sm:$0x1] %v756_v1  ;;  %v470_v23 = vmul.f32 0.1, %v756_v1 }
 0x122   :  { %v471_v24 = vadd.f32 %v470_v23, %v1068_v37 }
 0x124   :  { %vm472_vm13 = vcmp.gt.f32.partialorder %v471_v24, %v972_v11  ;;  %v477_v26 = vsub.f32 %v471_v24, %v972_v11 }
 0x125   :  { %v712_v25 = vsel %vm472_vm13, 1.0, %v897_v0 }
 0x126   :  { %476 = vst [vmem:[#allocation13 + $0xd] sm:$0x1] %v712_v25  ;;  %v478_v38 = vsel %vm472_vm13, %v477_v26, %v471_v24 }
 0x127   :  { %757 = vtanh.f32 %v478_v38 }
 0x131   :  { %v758_v20 = vpop.eup %757 }
 0x132   :  { %481 = vst [vmem:[#allocation10 + $0xd] sm:$0x1] %v758_v20  ;;  %v497_v30 = vmul.f32 0.1, %v758_v20 }
 0x134   :  { %v498_v32 = vadd.f32 %v497_v30, %v1078_v55 }
 0x136   :  { %vm499_vm14 = vcmp.gt.f32.partialorder %v498_v32, %v972_v11  ;;  %v504_v34 = vsub.f32 %v498_v32, %v972_v11 }
 0x137   :  { %v715_v37 = vsel %vm499_vm14, 1.0, %v897_v0 }
 0x138   :  { %503 = vst [vmem:[#allocation13 + $0xe] sm:$0x1] %v715_v37  ;;  %v505_v35 = vsel %vm499_vm14, %v504_v34, %v498_v32 }
 0x139   :  { %759 = vtanh.f32 %v505_v35 }
 0x143   :  { %v760_v36 = vpop.eup %759 }
 0x144   :  { %508 = vst [vmem:[#allocation10 + $0xe] sm:$0x1] %v760_v36  ;;  %v524_v6 = vmul.f32 0.1, %v760_v36 }
 0x146   :  { %v525_v29 = vadd.f32 %v524_v6, %v1085_v27 }
 0x148   :  { %vm526_vm15 = vcmp.gt.f32.partialorder %v525_v29, %v972_v11  ;;  %v531_v55 = vsub.f32 %v525_v29, %v972_v11 }
 0x149   :  { %v718_v41 = vsel %vm526_vm15, 1.0, %v897_v0 }
 0x14a   :  { %530 = vst [vmem:[#allocation13 + $0xf] sm:$0x1] %v718_v41  ;;  %v532_v50 = vsel %vm526_vm15, %v531_v55, %v525_v29 }
 0x14b   :  { %761 = vtanh.f32 %v532_v50 }
 0x14c   :  { %850 = shalt.err (!%p847_p3)
}
 0x14d   :  { %s851_s19 = scalar_lea.hbm %s1242_s4, 256 }
 0x14e   :  { %p852_p4 = scmp.ne.s32.totalorder %s1242_s4, %s851_s19  ;;  %p855_p5 = scmp.lt.u32.totalorder %s851_s19, %s1242_s4 }
 0x150   :  { %p857_p6 = pnand %p855_p5, %p852_p4 }
 0x152   :  { %860 = shalt.err (!%p857_p6)
}
 0x153   :  { %586 = dma.vmem_to_hbm [thread:$0]  %s581_s16, 256, %s1242_s4, [#allocation12], %s895_s0, %s895_s0, %s896_s13  }
 0x154   :  { %s902_s26 = smov [#allocation10]  }
 0x155   :  { %s556_s27 = sshll.u32 %s902_s26, 4  ;;  %v762_v0 = vpop.eup %761  ;;  %s557_s27 = int_to_ptr.vmem [resolvable:$true] %s556_s27 }
 0x156   :  { %535 = vst [vmem:[#allocation10 + $0xf] sm:$0x1] %v762_v0  ;;  %549 = vst [vmem:[#allocation3] sm:$0x1] %v762_v0  ;;  %s861_s28 = scalar_lea.vmem %s557_s27, 256  ;;  %p866_p8 = scmp.lt.s32.totalorder %s557_s27, %s557_s27 }
 0x157   :  { %p862_p7 = scmp.ne.s32.totalorder %s557_s27, %s861_s28  ;;  %p867_p9 = scmp.lt.s32.totalorder %s861_s28, %s861_s28 }
 0x159   :  { %p868_p10 = por %p867_p9, %p866_p8 }
 0x15b   :  { %p869_p11 = pnand %p868_p10, %p862_p7 }
 0x15d   :  { %872 = shalt.err (!%p869_p11)
}
 0x15e   :  { %s873_s6 = scalar_lea.hbm %s1240_s2, 256 }
 0x15f   :  { %p874_p12 = scmp.ne.s32.totalorder %s1240_s2, %s873_s6  ;;  %p877_p13 = scmp.lt.u32.totalorder %s873_s6, %s1240_s2 }
 0x161   :  { %p879_p0 = pnand %p877_p13, %p874_p12 }
 0x163   :  { %882 = shalt.err (!%p879_p0)
}
 0x164   :  { %562 = dma.vmem_to_hbm [thread:$0]  %s557_s27, 256, %s1240_s2, [#allocation7], %s895_s0, %s895_s0, %s896_s13  }
 0x165   :  { %887 = dma.done.wait [#allocation7], 256  }
 0x166   :  { %888 = vsyncadd [#allocation7], 4294967040 }
 0x167   :  { %889 = dma.done.wait [#allocation12], 512  }
 0x168   :  { %890 = vsyncadd [#allocation12], 4294966784 }
 0x169   :  { %891 = dma.done.wait [#allocation15], 256  }
 0x16a   :  { %892 = vsyncadd [#allocation15], 4294967040 }
 0x16b   :  { %611 = vsyncpa [#allocation6], 1 }
 0x16c   :  { %612 = vsyncpa [#allocation7], 1 }
 0x16d   :  { %613 = vsyncpa [#allocation12], 1 }
 0x16e   :  { %614 = vsyncpa [#allocation15], 1 }
 0x16f   :  { %615 = vsyncpa [#allocation8], 1 }

</bundles_post_ra>
